<compile_context>
chip_gen: v6e
topology: v6e:2x2x1
jax: 0.10.0
libtpu: 0.0.40
codegen_flags: <defaults>
</compile_context>

<pallas_src>
from functools import partial

import jax
import jax.numpy as jnp
from jax.experimental import pallas as pl
from jax.experimental.pallas import tpu as pltpu

DIM = 32            # hidden dim (module: dim = 32)
NUM_GC_LAYERS = 5   # implied by fc1 = Linear(dim * 5, dim)
NUM_FEATURES = 1    # module falls back to num_features = 1
NUM_CLASSES = 4     # synthetic dataset.num_classes
BN_EPS = 1e-5
OUT_LANES = 128     # lane-dense padded output width
NEG_BIG = -1e30     # pad-logit bias (exp(NEG_BIG - m) == 0 exactly in f32)


# ----------------------------- Pallas kernel -------------------------------

def _net_fused_kernel(a_ref, p_ref, x_ref,
                      w1s_ref, w2s_ref, aux_ref,
                      fc1w_ref, fc1b_ref, fc2w_ref, fc2b_ref,
                      o_ref):
    """Whole Net forward: 5x(GINConv->ReLU->BN) + readout + fc1/fc2 + log_softmax."""
    a_hat = a_ref[...]          # [N, N]  adjacency with self-loops folded (A + I)
    p = p_ref[...]              # [G, N]  graph pooling matrix
    x = x_ref[...]              # [N, NUM_FEATURES]  raw node features (no pad)

    def mlp_bn(z_pre, w2, b2, gamma, beta):
        # Linear1 output -> ReLU -> Linear2 -> outer ReLU -> folded BatchNorm
        z = jnp.maximum(z_pre, 0.0)
        z = jnp.dot(z, w2, preferred_element_type=jnp.float32) + b2
        z = jnp.maximum(z, 0.0)
        mean = jnp.mean(z, axis=0, keepdims=True)
        var = jnp.maximum(
            jnp.mean(z * z, axis=0, keepdims=True) - mean * mean, 0.0)
        s = gamma * jax.lax.rsqrt(var + BN_EPS)      # folded BN scale  [1, DIM]
        sh = beta - mean * s                         # folded BN shift  [1, DIM]
        return z * s + sh

    # ---- layer 0: 1 input channel -> Linear(1, DIM) is a broadcast multiply ----
    aux0 = aux_ref[0]                                # [4, DIM]: b1, b2, gamma, beta
    h = jnp.dot(a_hat, x, preferred_element_type=jnp.float32)        # [N, 1]
    w1_row0 = w1s_ref[0][0:1, :]                                     # [1, DIM]
    z_pre = h * w1_row0 + aux0[0:1, :]
    z = mlp_bn(z_pre, w2s_ref[0], aux0[1:2, :], aux0[2:3, :], aux0[3:4, :])
    zs = [z]

    # ---- layers 1..4 (static unroll, everything VMEM-resident) ----
    for i in range(1, NUM_GC_LAYERS):
        auxi = aux_ref[i]
        h = jnp.dot(a_hat, z, preferred_element_type=jnp.float32)    # [N, DIM]
        z_pre = jnp.dot(h, w1s_ref[i],
                        preferred_element_type=jnp.float32) + auxi[0:1, :]
        z = mlp_bn(z_pre, w2s_ref[i], auxi[1:2, :], auxi[2:3, :], auxi[3:4, :])
        zs.append(z)

    # ---- readout + head: two lane-dense matmuls instead of 10 tiny ones ----
    z_cat = jnp.concatenate(zs, axis=1)                              # [N, 5*DIM]
    pooled = jnp.dot(p, z_cat, preferred_element_type=jnp.float32)   # [G, 5*DIM]
    h_fc1 = jnp.maximum(
        jnp.dot(pooled, fc1w_ref[...], preferred_element_type=jnp.float32)
        + fc1b_ref[...], 0.0)                                        # [G, DIM]
    # TODO(synk): F.dropout(p=0.5, training=True) is RNG-dependent; implemented
    # as eval-mode identity (use pltpu.prng_* for training-mode parity).
    logits = jnp.dot(h_fc1, fc2w_ref[...],
                     preferred_element_type=jnp.float32) + fc2b_ref[...]  # [G, 128]
    m = jnp.max(logits, axis=-1, keepdims=True)
    lse = m + jnp.log(jnp.sum(jnp.exp(logits - m), axis=-1, keepdims=True))
    o_ref[...] = logits - lse


def _full(shape):
    """Whole-array block (block dims == array dims satisfies the (8,128) rule)."""
    zeros = (0,) * len(shape)
    return pl.BlockSpec(shape, lambda i, _z=zeros: _z)


def _net_pallas(a_hat, p, x, params):
    g = p.shape[0]
    # Lane-dense fc2: zero-pad weights, -1e30 pad bias so 128-lane log-softmax
    # is exact on the real NUM_CLASSES columns.
    fc2w_pad = jnp.zeros((DIM, OUT_LANES), jnp.float32)
    fc2w_pad = fc2w_pad.at[:, :NUM_CLASSES].set(params["fc2_w"])
    fc2b_pad = jnp.full((1, OUT_LANES), NEG_BIG, jnp.float32)
    fc2b_pad = fc2b_pad.at[:, :NUM_CLASSES].set(params["fc2_b"])

    ins = (a_hat, p, x,
           params["w1s"], params["w2s"], params["aux"],
           params["fc1_w"], params["fc1_b"], fc2w_pad, fc2b_pad)
    out = pl.pallas_call(
        _net_fused_kernel,
        grid=(1,),
        in_specs=[_full(t.shape) for t in ins],
        out_specs=_full((g, OUT_LANES)),
        out_shape=jax.ShapeDtypeStruct((g, OUT_LANES), jnp.float32),
        compiler_params=pltpu.CompilerParams(
            dimension_semantics=("arbitrary",)),
    )(*ins)
    return out[:, :NUM_CLASSES]


# ------------------------------- glue (JAX) --------------------------------

@partial(jax.jit, static_argnames=("num_graphs",))
def net_forward(x, edge_index, batch, params, num_graphs):
    """End-to-end jitted forward: graph matrices + fused Pallas kernel + slice."""
    n = x.shape[0]
    src, dst = edge_index[0], edge_index[1]
    # Â = A + I : GINConv(eps=0) self-loop folded into the adjacency.
    a_hat = (jnp.zeros((n, n), jnp.float32).at[dst, src].add(1.0)
             + jnp.eye(n, dtype=jnp.float32))
    p = (batch[None, :] == jnp.arange(num_graphs)[:, None]).astype(jnp.float32)
    return _net_pallas(a_hat, p, x, params)          # [G, NUM_CLASSES]


def init_params(key):
    keys = jax.random.split(key, 4 * NUM_GC_LAYERS + 3)
    w1_l, w2_l, aux_l = [], [], []
    in_dim = NUM_FEATURES
    idx = 0
    for _ in range(NUM_GC_LAYERS):
        w1 = jax.random.normal(keys[idx], (in_dim, DIM), jnp.float32) / jnp.sqrt(in_dim)
        idx += 1
        b1 = 0.1 * jax.random.normal(keys[idx], (DIM,), jnp.float32); idx += 1
        w2 = jax.random.normal(keys[idx], (DIM, DIM), jnp.float32) / jnp.sqrt(DIM)
        idx += 1
        b2 = 0.1 * jax.random.normal(keys[idx], (DIM,), jnp.float32); idx += 1
        if in_dim < DIM:
            # zero-pad layer-0 weight so all layers share one stacked tensor;
            # only row 0 is ever used for layer 0 (mathematically identical).
            w1 = jnp.concatenate(
                [w1, jnp.zeros((DIM - in_dim, DIM), jnp.float32)], axis=0)
        w1_l.append(w1)
        w2_l.append(w2)
        # packed per-layer aux: [b1, b2, gamma, beta] -> [4, DIM]
        aux_l.append(jnp.stack(
            [b1, b2, jnp.ones((DIM,), jnp.float32), jnp.zeros((DIM,), jnp.float32)]))
        in_dim = DIM
    fc1_w = jax.random.normal(keys[idx], (DIM * NUM_GC_LAYERS, DIM), jnp.float32) \
        / jnp.sqrt(DIM * NUM_GC_LAYERS)
    idx += 1
    fc1_b = 0.1 * jax.random.normal(keys[idx], (1, DIM), jnp.float32); idx += 1
    fc2_w = jax.random.normal(keys[idx], (DIM, NUM_CLASSES), jnp.float32) \
        / jnp.sqrt(DIM)
    fc2_b = jnp.zeros((1, NUM_CLASSES), jnp.float32)
    return dict(
        w1s=jnp.stack(w1_l),            # [5, DIM, DIM]
        w2s=jnp.stack(w2_l),            # [5, DIM, DIM]
        aux=jnp.stack(aux_l),           # [5, 4, DIM]  (b1, b2, gamma, beta)
        fc1_w=fc1_w, fc1_b=fc1_b, fc2_w=fc2_w, fc2_b=fc2_b)


def reference_forward(x, edge_index, batch, params, num_graphs):
    """Plain-JAX mirror of the PyTorch forward (eval-mode dropout, batch-stat BN)."""
    n = x.shape[0]
    src, dst = edge_index[0], edge_index[1]
    a = jnp.zeros((n, n), jnp.float32).at[dst, src].add(1.0)
    p = (batch[None, :] == jnp.arange(num_graphs)[:, None]).astype(jnp.float32)
    xc = jnp.concatenate(
        [x, jnp.zeros((n, DIM - x.shape[1]), jnp.float32)], axis=1)
    pooled = []
    for i in range(NUM_GC_LAYERS):
        b1 = params["aux"][i, 0][None, :]
        b2 = params["aux"][i, 1][None, :]
        gamma = params["aux"][i, 2][None, :]
        beta = params["aux"][i, 3][None, :]
        h = xc + a @ xc
        z = jnp.maximum(h @ params["w1s"][i] + b1, 0.0)
        z = z @ params["w2s"][i] + b2
        z = jnp.maximum(z, 0.0)
        mean = z.mean(0, keepdims=True)
        var = ((z - mean) ** 2).mean(0, keepdims=True)
        z = (z - mean) / jnp.sqrt(var + BN_EPS) * gamma + beta
        pooled.append(p @ z)
        xc = z
    xpool = jnp.concatenate(pooled, axis=1)              # [G, 5*dim]
    h = jnp.maximum(xpool @ params["fc1_w"] + params["fc1_b"], 0.0)
    logits = h @ params["fc2_w"] + params["fc2_b"]
    return jax.nn.log_softmax(logits, axis=-1)


if __name__ == "__main__":
    N, G = 16, 2
    key = jax.random.PRNGKey(0)
    k_x, k_p = jax.random.split(key)

    # graph structure: two 8-node rings, undirected (both directions)
    batch = jnp.array([0] * 8 + [1] * 8, dtype=jnp.int32)
    edges = []
    for start in (0, 8):
        for k in range(8):
            u, v = start + k, start + (k + 1) % 8
            edges.append((u, v))
            edges.append((v, u))
    edge_index = jnp.array(edges, dtype=jnp.int32).T     # [2, 32]

    x = jax.random.normal(k_x, (N, NUM_FEATURES), dtype=jnp.float32)
    params = init_params(k_p)

    out = net_forward(x, edge_index, batch, params, num_graphs=G)
    out = jax.block_until_ready(out)

    ref = reference_forward(x, edge_index, batch, params, num_graphs=G)
    assert out.shape == (G, NUM_CLASSES)
    assert jnp.all(jnp.isfinite(out))
    assert jnp.max(jnp.abs(out - ref)) < 5e-4, "mismatch vs plain-JAX reference"
    print("KERNEL_OK")
</pallas_src>

<mosaic_0001>
module attributes {stable_mosaic.version = 11 : i64} {
  func.func private @main(%arg0: i32) attributes {dimension_semantics = [#tpu.dimension_semantics<core_parallel>], iteration_bounds = array<i64: 2>, tpu.core_type = #tpu.core_type<sc_scalar_subcore>, window_params = []} {
    return
  }
}

module attributes {stable_mosaic.version = 11 : i64} {
  func.func private @main(%arg0: i32) attributes {dimension_semantics = [#tpu.dimension_semantics<core_parallel>], iteration_bounds = array<i64: 2>, tpu.core_type = #tpu.core_type<sc_scalar_subcore>, window_params = []} {
    return
  }
}

module attributes {stable_mosaic.version = 11 : i64} {
  func.func @_net_fused_kernel(%arg0: i32, %arg1: memref<16x16xf32, #tpu.memory_space<vmem>>, %arg2: memref<2x16xf32, #tpu.memory_space<vmem>>, %arg3: memref<16x1xf32, #tpu.memory_space<vmem>>, %arg4: memref<5x32x32xf32, #tpu.memory_space<vmem>>, %arg5: memref<5x32x32xf32, #tpu.memory_space<vmem>>, %arg6: memref<5x4x32xf32, #tpu.memory_space<vmem>>, %arg7: memref<160x32xf32, #tpu.memory_space<vmem>>, %arg8: memref<1x32xf32, #tpu.memory_space<vmem>>, %arg9: memref<32x128xf32, #tpu.memory_space<vmem>>, %arg10: memref<1x128xf32, #tpu.memory_space<vmem>>, %arg11: memref<2x128xf32, #tpu.memory_space<vmem>>) attributes {dimension_semantics = [#tpu.dimension_semantics<arbitrary>], iteration_bounds = array<i64: 1>, scalar_prefetch = 0 : i64, scratch_operands = 0 : i64, tpu.core_type = #tpu.core_type<tc>, window_params = [{pipeline_mode = #tpu.pipeline_mode<synchronous>, transform_indices = @transform_0, window_bounds = array<i64: 16, 16>}, {pipeline_mode = #tpu.pipeline_mode<synchronous>, transform_indices = @transform_1, window_bounds = array<i64: 2, 16>}, {pipeline_mode = #tpu.pipeline_mode<synchronous>, transform_indices = @transform_2, window_bounds = array<i64: 16, 1>}, {pipeline_mode = #tpu.pipeline_mode<synchronous>, transform_indices = @transform_3, window_bounds = array<i64: 5, 32, 32>}, {pipeline_mode = #tpu.pipeline_mode<synchronous>, transform_indices = @transform_4, window_bounds = array<i64: 5, 32, 32>}, {pipeline_mode = #tpu.pipeline_mode<synchronous>, transform_indices = @transform_5, window_bounds = array<i64: 5, 4, 32>}, {pipeline_mode = #tpu.pipeline_mode<synchronous>, transform_indices = @transform_6, window_bounds = array<i64: 160, 32>}, {pipeline_mode = #tpu.pipeline_mode<synchronous>, transform_indices = @transform_7, window_bounds = array<i64: 1, 32>}, {pipeline_mode = #tpu.pipeline_mode<synchronous>, transform_indices = @transform_8, window_bounds = array<i64: 32, 128>}, {pipeline_mode = #tpu.pipeline_mode<synchronous>, transform_indices = @transform_9, window_bounds = array<i64: 1, 128>}, {pipeline_mode = #tpu.pipeline_mode<synchronous>, transform_indices = @transform_10, window_bounds = array<i64: 2, 128>}]} {
    %c0 = arith.constant 0 : index
    %c0_0 = arith.constant 0 : index
    %0 = vector.load %arg1[%c0, %c0_0] : memref<16x16xf32, #tpu.memory_space<vmem>>, vector<16x16xf32>
    %c0_1 = arith.constant 0 : index
    %c0_2 = arith.constant 0 : index
    %1 = vector.load %arg2[%c0_1, %c0_2] : memref<2x16xf32, #tpu.memory_space<vmem>>, vector<2x16xf32>
    %c0_3 = arith.constant 0 : index
    %c0_4 = arith.constant 0 : index
    %2 = vector.load %arg3[%c0_3, %c0_4] : memref<16x1xf32, #tpu.memory_space<vmem>>, vector<16x1xf32>
    %c0_5 = arith.constant 0 : index
    %c0_6 = arith.constant 0 : index
    %c0_7 = arith.constant 0 : index
    %3 = vector.load %arg6[%c0_5, %c0_6, %c0_7] : memref<5x4x32xf32, #tpu.memory_space<vmem>>, vector<1x4x32xf32>
    %4 = vector.shape_cast %3 : vector<1x4x32xf32> to vector<4x32xf32>
    %cst = arith.constant dense<0.000000e+00> : vector<16x1xf32>
    %5 = tpu.matmul %0, %2, %cst {dimension_numbers = #tpu.dot_dimension_numbers<[1], [0], [0], [1], [0, 0, 1, 1], [], []>} : vector<16x16xf32>, vector<16x1xf32>, vector<16x1xf32> -> vector<16x1xf32>
    %c0_8 = arith.constant 0 : index
    %c0_9 = arith.constant 0 : index
    %c0_10 = arith.constant 0 : index
    %6 = vector.load %arg4[%c0_8, %c0_9, %c0_10] : memref<5x32x32xf32, #tpu.memory_space<vmem>>, vector<1x32x32xf32>
    %7 = vector.shape_cast %6 : vector<1x32x32xf32> to vector<32x32xf32>
    %8 = vector.extract_strided_slice %7 {offsets = [0, 0], sizes = [1, 32], strides = [1, 1]} : vector<32x32xf32> to vector<1x32xf32>
    %9 = vector.broadcast %5 : vector<16x1xf32> to vector<16x32xf32>
    %10 = vector.broadcast %8 : vector<1x32xf32> to vector<16x32xf32>
    %11 = arith.mulf %9, %10 : vector<16x32xf32>
    %12 = vector.extract_strided_slice %4 {offsets = [0, 0], sizes = [1, 32], strides = [1, 1]} : vector<4x32xf32> to vector<1x32xf32>
    %13 = vector.broadcast %12 : vector<1x32xf32> to vector<16x32xf32>
    %14 = arith.addf %11, %13 : vector<16x32xf32>
    %c0_11 = arith.constant 0 : index
    %c0_12 = arith.constant 0 : index
    %c0_13 = arith.constant 0 : index
    %15 = vector.load %arg5[%c0_11, %c0_12, %c0_13] : memref<5x32x32xf32, #tpu.memory_space<vmem>>, vector<1x32x32xf32>
    %16 = vector.shape_cast %15 : vector<1x32x32xf32> to vector<32x32xf32>
    %17 = vector.extract_strided_slice %4 {offsets = [1, 0], sizes = [1, 32], strides = [1, 1]} : vector<4x32xf32> to vector<1x32xf32>
    %18 = vector.extract_strided_slice %4 {offsets = [2, 0], sizes = [1, 32], strides = [1, 1]} : vector<4x32xf32> to vector<1x32xf32>
    %19 = vector.extract_strided_slice %4 {offsets = [3, 0], sizes = [1, 32], strides = [1, 1]} : vector<4x32xf32> to vector<1x32xf32>
    %cst_14 = arith.constant 0.000000e+00 : f32
    %20 = vector.broadcast %cst_14 : f32 to vector<16x32xf32>
    %21 = arith.maximumf %14, %20 : vector<16x32xf32>
    %cst_15 = arith.constant dense<0.000000e+00> : vector<16x32xf32>
    %22 = tpu.matmul %21, %16, %cst_15 {dimension_numbers = #tpu.dot_dimension_numbers<[1], [0], [0], [1], [0, 0, 1, 1], [], []>} : vector<16x32xf32>, vector<32x32xf32>, vector<16x32xf32> -> vector<16x32xf32>
    %23 = vector.broadcast %17 : vector<1x32xf32> to vector<16x32xf32>
    %24 = arith.addf %22, %23 : vector<16x32xf32>
    %cst_16 = arith.constant 0.000000e+00 : f32
    %25 = vector.broadcast %cst_16 : f32 to vector<16x32xf32>
    %26 = arith.maximumf %24, %25 : vector<16x32xf32>
    %cst_17 = arith.constant dense<0.000000e+00> : vector<32xf32>
    %27 = vector.multi_reduction <add>, %26, %cst_17 [0] : vector<16x32xf32> to vector<32xf32>
    %28 = vector.shape_cast %27 : vector<32xf32> to vector<1x32xf32>
    %cst_18 = arith.constant 1.600000e+01 : f32
    %29 = vector.broadcast %cst_18 : f32 to vector<1x32xf32>
    %30 = arith.divf %28, %29 : vector<1x32xf32>
    %31 = arith.mulf %26, %26 : vector<16x32xf32>
    %cst_19 = arith.constant dense<0.000000e+00> : vector<32xf32>
    %32 = vector.multi_reduction <add>, %31, %cst_19 [0] : vector<16x32xf32> to vector<32xf32>
    %33 = vector.shape_cast %32 : vector<32xf32> to vector<1x32xf32>
    %cst_20 = arith.constant 1.600000e+01 : f32
    %34 = vector.broadcast %cst_20 : f32 to vector<1x32xf32>
    %35 = arith.divf %33, %34 : vector<1x32xf32>
    %36 = arith.mulf %30, %30 : vector<1x32xf32>
    %37 = arith.subf %35, %36 : vector<1x32xf32>
    %cst_21 = arith.constant 0.000000e+00 : f32
    %38 = vector.broadcast %cst_21 : f32 to vector<1x32xf32>
    %39 = arith.maximumf %37, %38 : vector<1x32xf32>
    %cst_22 = arith.constant 9.99999974E-6 : f32
    %40 = vector.broadcast %cst_22 : f32 to vector<1x32xf32>
    %41 = arith.addf %39, %40 : vector<1x32xf32>
    %42 = math.rsqrt %41 : vector<1x32xf32>
    %43 = arith.mulf %18, %42 : vector<1x32xf32>
    %44 = arith.mulf %30, %43 : vector<1x32xf32>
    %45 = arith.subf %19, %44 : vector<1x32xf32>
    %46 = vector.broadcast %43 : vector<1x32xf32> to vector<16x32xf32>
    %47 = arith.mulf %26, %46 : vector<16x32xf32>
    %48 = vector.broadcast %45 : vector<1x32xf32> to vector<16x32xf32>
    %49 = arith.addf %47, %48 : vector<16x32xf32>
    %c1 = arith.constant 1 : index
    %c0_23 = arith.constant 0 : index
    %c0_24 = arith.constant 0 : index
    %50 = vector.load %arg6[%c1, %c0_23, %c0_24] : memref<5x4x32xf32, #tpu.memory_space<vmem>>, vector<1x4x32xf32>
    %51 = vector.shape_cast %50 : vector<1x4x32xf32> to vector<4x32xf32>
    %cst_25 = arith.constant dense<0.000000e+00> : vector<16x32xf32>
    %52 = tpu.matmul %0, %49, %cst_25 {dimension_numbers = #tpu.dot_dimension_numbers<[1], [0], [0], [1], [0, 0, 1, 1], [], []>} : vector<16x16xf32>, vector<16x32xf32>, vector<16x32xf32> -> vector<16x32xf32>
    %c1_26 = arith.constant 1 : index
    %c0_27 = arith.constant 0 : index
    %c0_28 = arith.constant 0 : index
    %53 = vector.load %arg4[%c1_26, %c0_27, %c0_28] : memref<5x32x32xf32, #tpu.memory_space<vmem>>, vector<1x32x32xf32>
    %54 = vector.shape_cast %53 : vector<1x32x32xf32> to vector<32x32xf32>
    %cst_29 = arith.constant dense<0.000000e+00> : vector<16x32xf32>
    %55 = tpu.matmul %52, %54, %cst_29 {dimension_numbers = #tpu.dot_dimension_numbers<[1], [0], [0], [1], [0, 0, 1, 1], [], []>} : vector<16x32xf32>, vector<32x32xf32>, vector<16x32xf32> -> vector<16x32xf32>
    %56 = vector.extract_strided_slice %51 {offsets = [0, 0], sizes = [1, 32], strides = [1, 1]} : vector<4x32xf32> to vector<1x32xf32>
    %57 = vector.broadcast %56 : vector<1x32xf32> to vector<16x32xf32>
    %58 = arith.addf %55, %57 : vector<16x32xf32>
    %c1_30 = arith.constant 1 : index
    %c0_31 = arith.constant 0 : index
    %c0_32 = arith.constant 0 : index
    %59 = vector.load %arg5[%c1_30, %c0_31, %c0_32] : memref<5x32x32xf32, #tpu.memory_space<vmem>>, vector<1x32x32xf32>
    %60 = vector.shape_cast %59 : vector<1x32x32xf32> to vector<32x32xf32>
    %61 = vector.extract_strided_slice %51 {offsets = [1, 0], sizes = [1, 32], strides = [1, 1]} : vector<4x32xf32> to vector<1x32xf32>
    %62 = vector.extract_strided_slice %51 {offsets = [2, 0], sizes = [1, 32], strides = [1, 1]} : vector<4x32xf32> to vector<1x32xf32>
    %63 = vector.extract_strided_slice %51 {offsets = [3, 0], sizes = [1, 32], strides = [1, 1]} : vector<4x32xf32> to vector<1x32xf32>
    %cst_33 = arith.constant 0.000000e+00 : f32
    %64 = vector.broadcast %cst_33 : f32 to vector<16x32xf32>
    %65 = arith.maximumf %58, %64 : vector<16x32xf32>
    %cst_34 = arith.constant dense<0.000000e+00> : vector<16x32xf32>
    %66 = tpu.matmul %65, %60, %cst_34 {dimension_numbers = #tpu.dot_dimension_numbers<[1], [0], [0], [1], [0, 0, 1, 1], [], []>} : vector<16x32xf32>, vector<32x32xf32>, vector<16x32xf32> -> vector<16x32xf32>
    %67 = vector.broadcast %61 : vector<1x32xf32> to vector<16x32xf32>
    %68 = arith.addf %66, %67 : vector<16x32xf32>
    %cst_35 = arith.constant 0.000000e+00 : f32
    %69 = vector.broadcast %cst_35 : f32 to vector<16x32xf32>
    %70 = arith.maximumf %68, %69 : vector<16x32xf32>
    %cst_36 = arith.constant dense<0.000000e+00> : vector<32xf32>
    %71 = vector.multi_reduction <add>, %70, %cst_36 [0] : vector<16x32xf32> to vector<32xf32>
    %72 = vector.shape_cast %71 : vector<32xf32> to vector<1x32xf32>
    %cst_37 = arith.constant 1.600000e+01 : f32
    %73 = vector.broadcast %cst_37 : f32 to vector<1x32xf32>
    %74 = arith.divf %72, %73 : vector<1x32xf32>
    %75 = arith.mulf %70, %70 : vector<16x32xf32>
    %cst_38 = arith.constant dense<0.000000e+00> : vector<32xf32>
    %76 = vector.multi_reduction <add>, %75, %cst_38 [0] : vector<16x32xf32> to vector<32xf32>
    %77 = vector.shape_cast %76 : vector<32xf32> to vector<1x32xf32>
    %cst_39 = arith.constant 1.600000e+01 : f32
    %78 = vector.broadcast %cst_39 : f32 to vector<1x32xf32>
    %79 = arith.divf %77, %78 : vector<1x32xf32>
    %80 = arith.mulf %74, %74 : vector<1x32xf32>
    %81 = arith.subf %79, %80 : vector<1x32xf32>
    %cst_40 = arith.constant 0.000000e+00 : f32
    %82 = vector.broadcast %cst_40 : f32 to vector<1x32xf32>
    %83 = arith.maximumf %81, %82 : vector<1x32xf32>
    %cst_41 = arith.constant 9.99999974E-6 : f32
    %84 = vector.broadcast %cst_41 : f32 to vector<1x32xf32>
    %85 = arith.addf %83, %84 : vector<1x32xf32>
    %86 = math.rsqrt %85 : vector<1x32xf32>
    %87 = arith.mulf %62, %86 : vector<1x32xf32>
    %88 = arith.mulf %74, %87 : vector<1x32xf32>
    %89 = arith.subf %63, %88 : vector<1x32xf32>
    %90 = vector.broadcast %87 : vector<1x32xf32> to vector<16x32xf32>
    %91 = arith.mulf %70, %90 : vector<16x32xf32>
    %92 = vector.broadcast %89 : vector<1x32xf32> to vector<16x32xf32>
    %93 = arith.addf %91, %92 : vector<16x32xf32>
    %c2 = arith.constant 2 : index
    %c0_42 = arith.constant 0 : index
    %c0_43 = arith.constant 0 : index
    %94 = vector.load %arg6[%c2, %c0_42, %c0_43] : memref<5x4x32xf32, #tpu.memory_space<vmem>>, vector<1x4x32xf32>
    %95 = vector.shape_cast %94 : vector<1x4x32xf32> to vector<4x32xf32>
    %cst_44 = arith.constant dense<0.000000e+00> : vector<16x32xf32>
    %96 = tpu.matmul %0, %93, %cst_44 {dimension_numbers = #tpu.dot_dimension_numbers<[1], [0], [0], [1], [0, 0, 1, 1], [], []>} : vector<16x16xf32>, vector<16x32xf32>, vector<16x32xf32> -> vector<16x32xf32>
    %c2_45 = arith.constant 2 : index
    %c0_46 = arith.constant 0 : index
    %c0_47 = arith.constant 0 : index
    %97 = vector.load %arg4[%c2_45, %c0_46, %c0_47] : memref<5x32x32xf32, #tpu.memory_space<vmem>>, vector<1x32x32xf32>
    %98 = vector.shape_cast %97 : vector<1x32x32xf32> to vector<32x32xf32>
    %cst_48 = arith.constant dense<0.000000e+00> : vector<16x32xf32>
    %99 = tpu.matmul %96, %98, %cst_48 {dimension_numbers = #tpu.dot_dimension_numbers<[1], [0], [0], [1], [0, 0, 1, 1], [], []>} : vector<16x32xf32>, vector<32x32xf32>, vector<16x32xf32> -> vector<16x32xf32>
    %100 = vector.extract_strided_slice %95 {offsets = [0, 0], sizes = [1, 32], strides = [1, 1]} : vector<4x32xf32> to vector<1x32xf32>
    %101 = vector.broadcast %100 : vector<1x32xf32> to vector<16x32xf32>
    %102 = arith.addf %99, %101 : vector<16x32xf32>
    %c2_49 = arith.constant 2 : index
    %c0_50 = arith.constant 0 : index
    %c0_51 = arith.constant 0 : index
    %103 = vector.load %arg5[%c2_49, %c0_50, %c0_51] : memref<5x32x32xf32, #tpu.memory_space<vmem>>, vector<1x32x32xf32>
    %104 = vector.shape_cast %103 : vector<1x32x32xf32> to vector<32x32xf32>
    %105 = vector.extract_strided_slice %95 {offsets = [1, 0], sizes = [1, 32], strides = [1, 1]} : vector<4x32xf32> to vector<1x32xf32>
    %106 = vector.extract_strided_slice %95 {offsets = [2, 0], sizes = [1, 32], strides = [1, 1]} : vector<4x32xf32> to vector<1x32xf32>
    %107 = vector.extract_strided_slice %95 {offsets = [3, 0], sizes = [1, 32], strides = [1, 1]} : vector<4x32xf32> to vector<1x32xf32>
    %cst_52 = arith.constant 0.000000e+00 : f32
    %108 = vector.broadcast %cst_52 : f32 to vector<16x32xf32>
    %109 = arith.maximumf %102, %108 : vector<16x32xf32>
    %cst_53 = arith.constant dense<0.000000e+00> : vector<16x32xf32>
    %110 = tpu.matmul %109, %104, %cst_53 {dimension_numbers = #tpu.dot_dimension_numbers<[1], [0], [0], [1], [0, 0, 1, 1], [], []>} : vector<16x32xf32>, vector<32x32xf32>, vector<16x32xf32> -> vector<16x32xf32>
    %111 = vector.broadcast %105 : vector<1x32xf32> to vector<16x32xf32>
    %112 = arith.addf %110, %111 : vector<16x32xf32>
    %cst_54 = arith.constant 0.000000e+00 : f32
    %113 = vector.broadcast %cst_54 : f32 to vector<16x32xf32>
    %114 = arith.maximumf %112, %113 : vector<16x32xf32>
    %cst_55 = arith.constant dense<0.000000e+00> : vector<32xf32>
    %115 = vector.multi_reduction <add>, %114, %cst_55 [0] : vector<16x32xf32> to vector<32xf32>
    %116 = vector.shape_cast %115 : vector<32xf32> to vector<1x32xf32>
    %cst_56 = arith.constant 1.600000e+01 : f32
    %117 = vector.broadcast %cst_56 : f32 to vector<1x32xf32>
    %118 = arith.divf %116, %117 : vector<1x32xf32>
    %119 = arith.mulf %114, %114 : vector<16x32xf32>
    %cst_57 = arith.constant dense<0.000000e+00> : vector<32xf32>
    %120 = vector.multi_reduction <add>, %119, %cst_57 [0] : vector<16x32xf32> to vector<32xf32>
    %121 = vector.shape_cast %120 : vector<32xf32> to vector<1x32xf32>
    %cst_58 = arith.constant 1.600000e+01 : f32
    %122 = vector.broadcast %cst_58 : f32 to vector<1x32xf32>
    %123 = arith.divf %121, %122 : vector<1x32xf32>
    %124 = arith.mulf %118, %118 : vector<1x32xf32>
    %125 = arith.subf %123, %124 : vector<1x32xf32>
    %cst_59 = arith.constant 0.000000e+00 : f32
    %126 = vector.broadcast %cst_59 : f32 to vector<1x32xf32>
    %127 = arith.maximumf %125, %126 : vector<1x32xf32>
    %cst_60 = arith.constant 9.99999974E-6 : f32
    %128 = vector.broadcast %cst_60 : f32 to vector<1x32xf32>
    %129 = arith.addf %127, %128 : vector<1x32xf32>
    %130 = math.rsqrt %129 : vector<1x32xf32>
    %131 = arith.mulf %106, %130 : vector<1x32xf32>
    %132 = arith.mulf %118, %131 : vector<1x32xf32>
    %133 = arith.subf %107, %132 : vector<1x32xf32>
    %134 = vector.broadcast %131 : vector<1x32xf32> to vector<16x32xf32>
    %135 = arith.mulf %114, %134 : vector<16x32xf32>
    %136 = vector.broadcast %133 : vector<1x32xf32> to vector<16x32xf32>
    %137 = arith.addf %135, %136 : vector<16x32xf32>
    %c3 = arith.constant 3 : index
    %c0_61 = arith.constant 0 : index
    %c0_62 = arith.constant 0 : index
    %138 = vector.load %arg6[%c3, %c0_61, %c0_62] : memref<5x4x32xf32, #tpu.memory_space<vmem>>, vector<1x4x32xf32>
    %139 = vector.shape_cast %138 : vector<1x4x32xf32> to vector<4x32xf32>
    %cst_63 = arith.constant dense<0.000000e+00> : vector<16x32xf32>
    %140 = tpu.matmul %0, %137, %cst_63 {dimension_numbers = #tpu.dot_dimension_numbers<[1], [0], [0], [1], [0, 0, 1, 1], [], []>} : vector<16x16xf32>, vector<16x32xf32>, vector<16x32xf32> -> vector<16x32xf32>
    %c3_64 = arith.constant 3 : index
    %c0_65 = arith.constant 0 : index
    %c0_66 = arith.constant 0 : index
    %141 = vector.load %arg4[%c3_64, %c0_65, %c0_66] : memref<5x32x32xf32, #tpu.memory_space<vmem>>, vector<1x32x32xf32>
    %142 = vector.shape_cast %141 : vector<1x32x32xf32> to vector<32x32xf32>
    %cst_67 = arith.constant dense<0.000000e+00> : vector<16x32xf32>
    %143 = tpu.matmul %140, %142, %cst_67 {dimension_numbers = #tpu.dot_dimension_numbers<[1], [0], [0], [1], [0, 0, 1, 1], [], []>} : vector<16x32xf32>, vector<32x32xf32>, vector<16x32xf32> -> vector<16x32xf32>
    %144 = vector.extract_strided_slice %139 {offsets = [0, 0], sizes = [1, 32], strides = [1, 1]} : vector<4x32xf32> to vector<1x32xf32>
    %145 = vector.broadcast %144 : vector<1x32xf32> to vector<16x32xf32>
    %146 = arith.addf %143, %145 : vector<16x32xf32>
    %c3_68 = arith.constant 3 : index
    %c0_69 = arith.constant 0 : index
    %c0_70 = arith.constant 0 : index
    %147 = vector.load %arg5[%c3_68, %c0_69, %c0_70] : memref<5x32x32xf32, #tpu.memory_space<vmem>>, vector<1x32x32xf32>
    %148 = vector.shape_cast %147 : vector<1x32x32xf32> to vector<32x32xf32>
    %149 = vector.extract_strided_slice %139 {offsets = [1, 0], sizes = [1, 32], strides = [1, 1]} : vector<4x32xf32> to vector<1x32xf32>
    %150 = vector.extract_strided_slice %139 {offsets = [2, 0], sizes = [1, 32], strides = [1, 1]} : vector<4x32xf32> to vector<1x32xf32>
    %151 = vector.extract_strided_slice %139 {offsets = [3, 0], sizes = [1, 32], strides = [1, 1]} : vector<4x32xf32> to vector<1x32xf32>
    %cst_71 = arith.constant 0.000000e+00 : f32
    %152 = vector.broadcast %cst_71 : f32 to vector<16x32xf32>
    %153 = arith.maximumf %146, %152 : vector<16x32xf32>
    %cst_72 = arith.constant dense<0.000000e+00> : vector<16x32xf32>
    %154 = tpu.matmul %153, %148, %cst_72 {dimension_numbers = #tpu.dot_dimension_numbers<[1], [0], [0], [1], [0, 0, 1, 1], [], []>} : vector<16x32xf32>, vector<32x32xf32>, vector<16x32xf32> -> vector<16x32xf32>
    %155 = vector.broadcast %149 : vector<1x32xf32> to vector<16x32xf32>
    %156 = arith.addf %154, %155 : vector<16x32xf32>
    %cst_73 = arith.constant 0.000000e+00 : f32
    %157 = vector.broadcast %cst_73 : f32 to vector<16x32xf32>
    %158 = arith.maximumf %156, %157 : vector<16x32xf32>
    %cst_74 = arith.constant dense<0.000000e+00> : vector<32xf32>
    %159 = vector.multi_reduction <add>, %158, %cst_74 [0] : vector<16x32xf32> to vector<32xf32>
    %160 = vector.shape_cast %159 : vector<32xf32> to vector<1x32xf32>
    %cst_75 = arith.constant 1.600000e+01 : f32
    %161 = vector.broadcast %cst_75 : f32 to vector<1x32xf32>
    %162 = arith.divf %160, %161 : vector<1x32xf32>
    %163 = arith.mulf %158, %158 : vector<16x32xf32>
    %cst_76 = arith.constant dense<0.000000e+00> : vector<32xf32>
    %164 = vector.multi_reduction <add>, %163, %cst_76 [0] : vector<16x32xf32> to vector<32xf32>
    %165 = vector.shape_cast %164 : vector<32xf32> to vector<1x32xf32>
    %cst_77 = arith.constant 1.600000e+01 : f32
    %166 = vector.broadcast %cst_77 : f32 to vector<1x32xf32>
    %167 = arith.divf %165, %166 : vector<1x32xf32>
    %168 = arith.mulf %162, %162 : vector<1x32xf32>
    %169 = arith.subf %167, %168 : vector<1x32xf32>
    %cst_78 = arith.constant 0.000000e+00 : f32
    %170 = vector.broadcast %cst_78 : f32 to vector<1x32xf32>
    %171 = arith.maximumf %169, %170 : vector<1x32xf32>
    %cst_79 = arith.constant 9.99999974E-6 : f32
    %172 = vector.broadcast %cst_79 : f32 to vector<1x32xf32>
    %173 = arith.addf %171, %172 : vector<1x32xf32>
    %174 = math.rsqrt %173 : vector<1x32xf32>
    %175 = arith.mulf %150, %174 : vector<1x32xf32>
    %176 = arith.mulf %162, %175 : vector<1x32xf32>
    %177 = arith.subf %151, %176 : vector<1x32xf32>
    %178 = vector.broadcast %175 : vector<1x32xf32> to vector<16x32xf32>
    %179 = arith.mulf %158, %178 : vector<16x32xf32>
    %180 = vector.broadcast %177 : vector<1x32xf32> to vector<16x32xf32>
    %181 = arith.addf %179, %180 : vector<16x32xf32>
    %c4 = arith.constant 4 : index
    %c0_80 = arith.constant 0 : index
    %c0_81 = arith.constant 0 : index
    %182 = vector.load %arg6[%c4, %c0_80, %c0_81] : memref<5x4x32xf32, #tpu.memory_space<vmem>>, vector<1x4x32xf32>
    %183 = vector.shape_cast %182 : vector<1x4x32xf32> to vector<4x32xf32>
    %cst_82 = arith.constant dense<0.000000e+00> : vector<16x32xf32>
    %184 = tpu.matmul %0, %181, %cst_82 {dimension_numbers = #tpu.dot_dimension_numbers<[1], [0], [0], [1], [0, 0, 1, 1], [], []>} : vector<16x16xf32>, vector<16x32xf32>, vector<16x32xf32> -> vector<16x32xf32>
    %c4_83 = arith.constant 4 : index
    %c0_84 = arith.constant 0 : index
    %c0_85 = arith.constant 0 : index
    %185 = vector.load %arg4[%c4_83, %c0_84, %c0_85] : memref<5x32x32xf32, #tpu.memory_space<vmem>>, vector<1x32x32xf32>
    %186 = vector.shape_cast %185 : vector<1x32x32xf32> to vector<32x32xf32>
    %cst_86 = arith.constant dense<0.000000e+00> : vector<16x32xf32>
    %187 = tpu.matmul %184, %186, %cst_86 {dimension_numbers = #tpu.dot_dimension_numbers<[1], [0], [0], [1], [0, 0, 1, 1], [], []>} : vector<16x32xf32>, vector<32x32xf32>, vector<16x32xf32> -> vector<16x32xf32>
    %188 = vector.extract_strided_slice %183 {offsets = [0, 0], sizes = [1, 32], strides = [1, 1]} : vector<4x32xf32> to vector<1x32xf32>
    %189 = vector.broadcast %188 : vector<1x32xf32> to vector<16x32xf32>
    %190 = arith.addf %187, %189 : vector<16x32xf32>
    %c4_87 = arith.constant 4 : index
    %c0_88 = arith.constant 0 : index
    %c0_89 = arith.constant 0 : index
    %191 = vector.load %arg5[%c4_87, %c0_88, %c0_89] : memref<5x32x32xf32, #tpu.memory_space<vmem>>, vector<1x32x32xf32>
    %192 = vector.shape_cast %191 : vector<1x32x32xf32> to vector<32x32xf32>
    %193 = vector.extract_strided_slice %183 {offsets = [1, 0], sizes = [1, 32], strides = [1, 1]} : vector<4x32xf32> to vector<1x32xf32>
    %194 = vector.extract_strided_slice %183 {offsets = [2, 0], sizes = [1, 32], strides = [1, 1]} : vector<4x32xf32> to vector<1x32xf32>
    %195 = vector.extract_strided_slice %183 {offsets = [3, 0], sizes = [1, 32], strides = [1, 1]} : vector<4x32xf32> to vector<1x32xf32>
    %cst_90 = arith.constant 0.000000e+00 : f32
    %196 = vector.broadcast %cst_90 : f32 to vector<16x32xf32>
    %197 = arith.maximumf %190, %196 : vector<16x32xf32>
    %cst_91 = arith.constant dense<0.000000e+00> : vector<16x32xf32>
    %198 = tpu.matmul %197, %192, %cst_91 {dimension_numbers = #tpu.dot_dimension_numbers<[1], [0], [0], [1], [0, 0, 1, 1], [], []>} : vector<16x32xf32>, vector<32x32xf32>, vector<16x32xf32> -> vector<16x32xf32>
    %199 = vector.broadcast %193 : vector<1x32xf32> to vector<16x32xf32>
    %200 = arith.addf %198, %199 : vector<16x32xf32>
    %cst_92 = arith.constant 0.000000e+00 : f32
    %201 = vector.broadcast %cst_92 : f32 to vector<16x32xf32>
    %202 = arith.maximumf %200, %201 : vector<16x32xf32>
    %cst_93 = arith.constant dense<0.000000e+00> : vector<32xf32>
    %203 = vector.multi_reduction <add>, %202, %cst_93 [0] : vector<16x32xf32> to vector<32xf32>
    %204 = vector.shape_cast %203 : vector<32xf32> to vector<1x32xf32>
    %cst_94 = arith.constant 1.600000e+01 : f32
    %205 = vector.broadcast %cst_94 : f32 to vector<1x32xf32>
    %206 = arith.divf %204, %205 : vector<1x32xf32>
    %207 = arith.mulf %202, %202 : vector<16x32xf32>
    %cst_95 = arith.constant dense<0.000000e+00> : vector<32xf32>
    %208 = vector.multi_reduction <add>, %207, %cst_95 [0] : vector<16x32xf32> to vector<32xf32>
    %209 = vector.shape_cast %208 : vector<32xf32> to vector<1x32xf32>
    %cst_96 = arith.constant 1.600000e+01 : f32
    %210 = vector.broadcast %cst_96 : f32 to vector<1x32xf32>
    %211 = arith.divf %209, %210 : vector<1x32xf32>
    %212 = arith.mulf %206, %206 : vector<1x32xf32>
    %213 = arith.subf %211, %212 : vector<1x32xf32>
    %cst_97 = arith.constant 0.000000e+00 : f32
    %214 = vector.broadcast %cst_97 : f32 to vector<1x32xf32>
    %215 = arith.maximumf %213, %214 : vector<1x32xf32>
    %cst_98 = arith.constant 9.99999974E-6 : f32
    %216 = vector.broadcast %cst_98 : f32 to vector<1x32xf32>
    %217 = arith.addf %215, %216 : vector<1x32xf32>
    %218 = math.rsqrt %217 : vector<1x32xf32>
    %219 = arith.mulf %194, %218 : vector<1x32xf32>
    %220 = arith.mulf %206, %219 : vector<1x32xf32>
    %221 = arith.subf %195, %220 : vector<1x32xf32>
    %222 = vector.broadcast %219 : vector<1x32xf32> to vector<16x32xf32>
    %223 = arith.mulf %202, %222 : vector<16x32xf32>
    %224 = vector.broadcast %221 : vector<1x32xf32> to vector<16x32xf32>
    %225 = arith.addf %223, %224 : vector<16x32xf32>
    %226 = tpu.concatenate %49, %93, %137, %181, %225 in 1 : vector<16x32xf32>, vector<16x32xf32>, vector<16x32xf32>, vector<16x32xf32>, vector<16x32xf32> -> vector<16x160xf32>
    %cst_99 = arith.constant dense<0.000000e+00> : vector<2x160xf32>
    %227 = tpu.matmul %1, %226, %cst_99 {dimension_numbers = #tpu.dot_dimension_numbers<[1], [0], [0], [1], [0, 0, 1, 1], [], []>} : vector<2x16xf32>, vector<16x160xf32>, vector<2x160xf32> -> vector<2x160xf32>
    %c0_100 = arith.constant 0 : index
    %c0_101 = arith.constant 0 : index
    %228 = vector.load %arg7[%c0_100, %c0_101] : memref<160x32xf32, #tpu.memory_space<vmem>>, vector<160x32xf32>
    %cst_102 = arith.constant dense<0.000000e+00> : vector<2x32xf32>
    %229 = tpu.matmul %227, %228, %cst_102 {dimension_numbers = #tpu.dot_dimension_numbers<[1], [0], [0], [1], [0, 0, 1, 1], [], []>} : vector<2x160xf32>, vector<160x32xf32>, vector<2x32xf32> -> vector<2x32xf32>
    %c0_103 = arith.constant 0 : index
    %c0_104 = arith.constant 0 : index
    %230 = vector.load %arg8[%c0_103, %c0_104] : memref<1x32xf32, #tpu.memory_space<vmem>>, vector<1x32xf32>
    %231 = vector.broadcast %230 : vector<1x32xf32> to vector<2x32xf32>
    %232 = arith.addf %229, %231 : vector<2x32xf32>
    %cst_105 = arith.constant 0.000000e+00 : f32
    %233 = vector.broadcast %cst_105 : f32 to vector<2x32xf32>
    %234 = arith.maximumf %232, %233 : vector<2x32xf32>
    %c0_106 = arith.constant 0 : index
    %c0_107 = arith.constant 0 : index
    %235 = vector.load %arg9[%c0_106, %c0_107] : memref<32x128xf32, #tpu.memory_space<vmem>>, vector<32x128xf32>
    %cst_108 = arith.constant dense<0.000000e+00> : vector<2x128xf32>
    %236 = tpu.matmul %234, %235, %cst_108 {dimension_numbers = #tpu.dot_dimension_numbers<[1], [0], [0], [1], [0, 0, 1, 1], [], []>} : vector<2x32xf32>, vector<32x128xf32>, vector<2x128xf32> -> vector<2x128xf32>
    %c0_109 = arith.constant 0 : index
    %c0_110 = arith.constant 0 : index
    %237 = vector.load %arg10[%c0_109, %c0_110] : memref<1x128xf32, #tpu.memory_space<vmem>>, vector<1x128xf32>
    %238 = vector.broadcast %237 : vector<1x128xf32> to vector<2x128xf32>
    %239 = arith.addf %236, %238 : vector<2x128xf32>
    %cst_111 = arith.constant dense<0xFF800000> : vector<2xf32>
    %240 = vector.multi_reduction <maximumf>, %239, %cst_111 [1] : vector<2x128xf32> to vector<2xf32>
    %241 = vector.shape_cast %240 : vector<2xf32> to vector<2x1xf32>
    %242 = vector.broadcast %241 : vector<2x1xf32> to vector<2x128xf32>
    %243 = arith.subf %239, %242 : vector<2x128xf32>
    %244 = math.exp %243 : vector<2x128xf32>
    %cst_112 = arith.constant dense<0.000000e+00> : vector<2xf32>
    %245 = vector.multi_reduction <add>, %244, %cst_112 [1] : vector<2x128xf32> to vector<2xf32>
    %246 = vector.shape_cast %245 : vector<2xf32> to vector<2x1xf32>
    %247 = math.log %246 : vector<2x1xf32>
    %248 = arith.addf %241, %247 : vector<2x1xf32>
    %249 = vector.broadcast %248 : vector<2x1xf32> to vector<2x128xf32>
    %250 = arith.subf %239, %249 : vector<2x128xf32>
    %c0_113 = arith.constant 0 : index
    %c0_114 = arith.constant 0 : index
    %251 = vector.load %arg11[%c0_113, %c0_114] : memref<2x128xf32, #tpu.memory_space<vmem>>, vector<2x128xf32>
    tpu.vector_store %arg11[%c0_113, %c0_114], %250 {strides = array<i32>} : memref<2x128xf32, #tpu.memory_space<vmem>>, vector<2x128xf32>,
    return
  }
  func.func @transform_0(%arg0: i32) -> (i32, i32) {
    %c0_i32 = arith.constant 0 : i32
    %c0_i32_0 = arith.constant 0 : i32
    %c0_i32_1 = arith.constant 0 : i32
    return %c0_i32, %c0_i32_0 : i32, i32
  }
  func.func @transform_1(%arg0: i32) -> (i32, i32) {
    %c0_i32 = arith.constant 0 : i32
    %c0_i32_0 = arith.constant 0 : i32
    %c0_i32_1 = arith.constant 0 : i32
    return %c0_i32, %c0_i32_0 : i32, i32
  }
  func.func @transform_2(%arg0: i32) -> (i32, i32) {
    %c0_i32 = arith.constant 0 : i32
    %c0_i32_0 = arith.constant 0 : i32
    %c0_i32_1 = arith.constant 0 : i32
    return %c0_i32, %c0_i32_0 : i32, i32
  }
  func.func @transform_3(%arg0: i32) -> (i32, i32, i32) {
    %c0_i32 = arith.constant 0 : i32
    %c0_i32_0 = arith.constant 0 : i32
    %c0_i32_1 = arith.constant 0 : i32
    %c0_i32_2 = arith.constant 0 : i32
    return %c0_i32, %c0_i32_0, %c0_i32_1 : i32, i32, i32
  }
  func.func @transform_4(%arg0: i32) -> (i32, i32, i32) {
    %c0_i32 = arith.constant 0 : i32
    %c0_i32_0 = arith.constant 0 : i32
    %c0_i32_1 = arith.constant 0 : i32
    %c0_i32_2 = arith.constant 0 : i32
    return %c0_i32, %c0_i32_0, %c0_i32_1 : i32, i32, i32
  }
  func.func @transform_5(%arg0: i32) -> (i32, i32, i32) {
    %c0_i32 = arith.constant 0 : i32
    %c0_i32_0 = arith.constant 0 : i32
    %c0_i32_1 = arith.constant 0 : i32
    %c0_i32_2 = arith.constant 0 : i32
    return %c0_i32, %c0_i32_0, %c0_i32_1 : i32, i32, i32
  }
  func.func @transform_6(%arg0: i32) -> (i32, i32) {
    %c0_i32 = arith.constant 0 : i32
    %c0_i32_0 = arith.constant 0 : i32
    %c0_i32_1 = arith.constant 0 : i32
    return %c0_i32, %c0_i32_0 : i32, i32
  }
  func.func @transform_7(%arg0: i32) -> (i32, i32) {
    %c0_i32 = arith.constant 0 : i32
    %c0_i32_0 = arith.constant 0 : i32
    %c0_i32_1 = arith.constant 0 : i32
    return %c0_i32, %c0_i32_0 : i32, i32
  }
  func.func @transform_8(%arg0: i32) -> (i32, i32) {
    %c0_i32 = arith.constant 0 : i32
    %c0_i32_0 = arith.constant 0 : i32
    %c0_i32_1 = arith.constant 0 : i32
    return %c0_i32, %c0_i32_0 : i32, i32
  }
  func.func @transform_9(%arg0: i32) -> (i32, i32) {
    %c0_i32 = arith.constant 0 : i32
    %c0_i32_0 = arith.constant 0 : i32
    %c0_i32_1 = arith.constant 0 : i32
    return %c0_i32, %c0_i32_0 : i32, i32
  }
  func.func @transform_10(%arg0: i32) -> (i32, i32) {
    %c0_i32 = arith.constant 0 : i32
    %c0_i32_0 = arith.constant 0 : i32
    %c0_i32_1 = arith.constant 0 : i32
    return %c0_i32, %c0_i32_0 : i32, i32
  }
}

</mosaic_0001>

<bundles_post_ra>
// kernel: net_forward.1
= control target key start
LH: loop header
LB: loop body
LE: loop exit
PB: predicated region body
PF: predicated region fallthrough
CT: control target
= control target key end

     0   :  { %15 = vsyncpa [#allocation3], 0  ;;  %s2636_s0 = inlined_call_operand.hbm [shape: f32[16,16], index: 0, kind: input, shape index: {}]   ;;  %s2637_s1 = inlined_call_operand.vmem [shape: f32[2,16], index: 1, kind: input, shape index: {}]   ;;  %s2638_s2 = inlined_call_operand.vmem [shape: f32[16,1], index: 2, kind: input, shape index: {}]   ;;  %s2639_s3 = inlined_call_operand.vmem [shape: f32[5,32,32], index: 3, kind: input, shape index: {}]   ;;  %s2640_s4 = inlined_call_operand.vmem [shape: f32[5,32,32], index: 4, kind: input, shape index: {}]   ;;  %s2641_s5 = inlined_call_operand.vmem [shape: f32[5,4,32], index: 5, kind: input, shape index: {}]   ;;  %s2642_s6 = inlined_call_operand.vmem [shape: f32[160,32], index: 6, kind: input, shape index: {}]   ;;  %s2643_s7 = inlined_call_operand.vmem [shape: f32[1,32], index: 7, kind: input, shape index: {}]   ;;  %s2644_s8 = inlined_call_operand.vmem [shape: f32[32,128], index: 8, kind: input, shape index: {}]   ;;  %s2645_s9 = inlined_call_operand.vmem [shape: f32[1,128], index: 9, kind: input, shape index: {}]   ;;  %s2646_s10 = inlined_call_operand.hbm [shape: f32[2,128], index: 10, kind: output, shape index: {}]  }
   0x1   :  { %16 = vsyncpa [#allocation4], 0  ;;  %s2208_s13 = smov [#allocation2]  }
   0x2   :  { %s22_s14 = sshll.u32 %s2208_s13, 4  ;;  %s23_s14 = int_to_ptr.vmem [resolvable:$true] %s22_s14 }
   0x3   :  { %s2172_s15 = scalar_lea.vmem %s23_s14, 256  ;;  %p2177_p1 = scmp.lt.s32.totalorder %s23_s14, %s23_s14 }
   0x4   :  { %p2173_p0 = scmp.ne.s32.totalorder %s23_s14, %s2172_s15  ;;  %p2178_p2 = scmp.lt.s32.totalorder %s2172_s15, %s2172_s15 }
   0x6   :  { %p2179_p3 = por %p2178_p2, %p2177_p1 }
   0x8   :  { %p2180_p4 = pnand %p2179_p3, %p2173_p0 }
   0xa   :  { %2183 = shalt.err (!%p2180_p4)
}
   0xb   :  { %s2209_s16 = smov 128   ;;  %s2210_s17 = smov 8  }
   0xc   :  { %28 = dma.hbm_to_vmem [thread:$0]  %s2636_s0, 256, %s23_s14, [#allocation3], %s2209_s16, %s2209_s16, %s2210_s17  }
   0xd   :  { %2204 = dma.done.wait [#allocation3], 256  }
   0xe   :  { %2205 = vsyncadd [#allocation3], 4294967040  ;;  %vm56_vm0 = vcmask 130048   ;;  %v54_v0 = vld [vmem:[%s2638_s2 + $0x8] sm:$0xff]  ;;  %v53_v1 = vld [vmem:[%s2638_s2] sm:$0xff]  ;;  %v2211_v4 = vmov 0   ;;  %v149_v11 = vlaneseq }
   0xf   :  { %v2282_v2 = vld [vmem:[#allocation2] sm:$0xff]  ;;  %1994 = vmatprep.subr.mxu0 %v54_v0  ;;  %v2286_v3 = vld [vmem:[#allocation2 + $0x8] sm:$0xff]  ;;  %2149 = vset.pattern.permute.xlu0 %v2211_v4  ;;  %v164_v5 = vld [vmem:[%s2640_s4 + $0x18] sm:$0xff]  ;;  %vm171_vm1 = vcmask 261120   ;;  %s2212_s14 = smov 32   ;;  %s2213_s11 = smov 64  }
  0x10   :  { %1998 = vmatprep.mubr.msk.f32.mxu0 %vm56_vm0, %v2282_v2  ;;  %1995 = vmatpush3.msra.mxu0 %v54_v0  ;;  %v163_v8 = vld [vmem:[%s2640_s4 + $0x10] sm:$0xff]  ;;  %v162_v9 = vld [vmem:[%s2640_s4 + $0x8] sm:$0xff]  ;;  %v161_v10 = vld [vmem:[%s2640_s4] sm:$0xff]  ;;  %v2304_v12 = vshrl.u32 %v149_v11, 7  ;;  %s2214_s28 = smov 96   ;;  %vm1551_vm2 = vcmask 523264  }
  0x11   :  { %1996 = vmatprep.subr.mxu0 %v53_v1  ;;  %2001 = vmatprep.subr.mxu1 %v164_v5  ;;  %v138_v14 = vld [vmem:[%s2639_s3] sm:$0xff]  ;;  %v1856_v26 = vld [vmem:[%s2639_s3 + $0x38] sm:$0xff]  ;;  %v1855_v27 = vld [vmem:[%s2639_s3 + $0x30] sm:$0xff]  ;;  %vm1554_vm3 = vcmask 785408   ;;  %vm2216_vm4 = vmmov 0   ;;  %vm1816_vm5 = vcmask 1041408  }
  0x12   :  { %1997 = vmatpush3.msra.mxu0 %v53_v1  ;;  %2002 = vmatpush3.msra.mxu1 %v164_v5  ;;  %v2307_v13 = vsub.s32 0, %v2304_v12  ;;  %v55_v15 = vld [vmem:[%s2641_s5] sm:$0xf]  ;;  %v2326_v28 = vsub.s32 1, %v2304_v12  ;;  %v2334_v0 = vsub.s32 2, %v2304_v12 }
  0x13   :  { %1999 = vmatmul.mubr.msk.f32.vlgmr.msra.gmra.mxu0 %vm56_vm0, %v2286_v3  ;;  %2003 = vmatprep.subr.mxu1 %v163_v8 }
  0x14   :  { %2016 = vmatprep.mubr.msk.f32.mxu0 %vm56_vm0, %v2282_v2  ;;  %2004 = vmatpush3.msra.mxu1 %v163_v8  ;;  %v152_v16 = vrot.slane %v138_v14, %v2307_v13  ;;  %v158_v17 = vrot.slane %v55_v15, %v2307_v13  ;;  %v170_v29 = vrot.slane %v55_v15, %v2326_v28 }
  0x15   :  { %2005 = vmatprep.subr.mxu1 %v162_v9 }
  0x16   :  { %2006 = vmatpush3.msra.mxu1 %v162_v9 }
  0x17   :  { %2007 = vmatprep.subr.mxu1 %v161_v10 }
  0x18   :  { %2008 = vmatpush3.msra.mxu1 %v161_v10 }
  0x19   :  { %2019 = vmatprep.subr.mxu1 %v1856_v26 }
  0xd3   :  { %v2000_v6 = vpop.f32.mrf.mxu0 }
  0xd5   :  { %v129_v7 = vpop.f32.mrf.mxu0 }
  0xd6   :  { %141 = vperm.xlu0 %2149, %v129_v7  }
  0xda   :  { %146 = vperm.xlu0 %2149, %v2000_v6   ;;  %v2338_v6 = vsub.s32 3, %v2304_v12  ;;  %v1854_v12 = vld [vmem:[%s2639_s3 + $0x28] sm:$0xff] }
 0x151   :  { %v142_v18 = vpop.permute.xlu0 %141 }
 0x152   :  { %v153_v19 = vmul.f32 %v152_v16, %v142_v18  ;;  %v1862_v18 = vld [vmem:[%s2640_s4 + $0x38] sm:$0xff] }
 0x154   :  { %v159_v20 = vadd.f32 %v158_v17, %v153_v19  ;;  %v1861_v19 = vld [vmem:[%s2640_s4 + $0x30] sm:$0xff] }
 0x155   :  { %v147_v21 = vpop.permute.xlu0 %146 }
 0x156   :  { %v154_v22 = vmul.f32 %v152_v16, %v147_v21  ;;  %v165_v23 = vmax.f32 %v159_v20, 0.0  ;;  %v1860_v20 = vld [vmem:[%s2640_s4 + $0x28] sm:$0xff]  ;;  %v1859_v21 = vld [vmem:[%s2640_s4 + $0x20] sm:$0xff] }
 0x158   :  { %v160_v24 = vadd.f32 %v158_v17, %v154_v22  ;;  %2009 = vmatprep.mubr.msk.f32.mxu1 %vm171_vm1, %v165_v23  ;;  %v1850_v22 = vld [vmem:[%s2641_s5 + $0x4] sm:$0xf] }
 0x159   :  { %v386_v23 = vrot.slane %v1850_v22, %v2307_v13 }
 0x15a   :  { %v166_v25 = vmax.f32 %v160_v24, 0.0 }
 0x15c   :  { %2010 = vmatmul.mubr.msk.f32.vlgmr.msra.gmra.mxu1 %vm171_vm1, %v166_v25 }
 0x15d   :  { %2020 = vmatpush3.msra.mxu1 %v1856_v26 }
 0x15e   :  { %2021 = vmatprep.subr.mxu1 %v1855_v27 }
 0x15f   :  { %2022 = vmatpush3.msra.mxu1 %v1855_v27 }
 0x160   :  { %2023 = vmatprep.subr.mxu1 %v1854_v12 }
 0x161   :  { %2024 = vmatpush3.msra.mxu1 %v1854_v12 }
 0x21c   :  { %v2011_v30 = vpop.f32.mrf.mxu1 }
 0x21d   :  { %v250_v31 = vadd.f32 %v2011_v30, %v170_v29 }
 0x21e   :  { %v244_v32 = vpop.f32.mrf.mxu1 }
 0x21f   :  { %v254_v33 = vmax.f32 %v250_v31, 0.0  ;;  %v245_v34 = vadd.f32 %v244_v32, %v170_v29  ;;  %v478_v31 = vrot.slane %v1850_v22, %v2326_v28 }
 0x221   :  { %v267_v35 = vmul.f32 %v254_v33, %v254_v33  ;;  %v253_v36 = vmax.f32 %v245_v34, 0.0  ;;  %v256_v37 = vsel %vm171_vm1, %v254_v33, 0.0 }
 0x223   :  { %v255_v38 = vsel %vm171_vm1, %v253_v36, 0.0  ;;  %v266_v39 = vmul.f32 %v253_v36, %v253_v36  ;;  %v269_v41 = vsel %vm171_vm1, %v267_v35, 0.0 }
 0x224   :  { %v257_v40 = vadd.f32 %v256_v37, %v255_v38 }
 0x225   :  { %v268_v42 = vsel %vm171_vm1, %v266_v39, 0.0 }
 0x226   :  { %v258_v43 = vrot.slane %v257_v40, 4  ;;  %v270_v44 = vadd.f32 %v269_v41, %v268_v42 }
 0x228   :  { %v259_v45 = vadd.f32 %v258_v43, %v257_v40  ;;  %v271_v46 = vrot.slane %v270_v44, 4 }
 0x22a   :  { %v260_v47 = vrot.slane %v259_v45, 2  ;;  %v272_v48 = vadd.f32 %v271_v46, %v270_v44 }
 0x22c   :  { %v261_v49 = vadd.f32 %v260_v47, %v259_v45  ;;  %v273_v50 = vrot.slane %v272_v48, 2 }
 0x22e   :  { %v262_v51 = vrot.slane %v261_v49, 1  ;;  %v274_v52 = vadd.f32 %v273_v50, %v272_v48 }
 0x230   :  { %v263_v53 = vadd.f32 %v262_v51, %v261_v49  ;;  %v275_v54 = vrot.slane %v274_v52, 1 }
 0x232   :  { %v265_v55 = vmul.f32 0.0625, %v263_v53  ;;  %v276_v56 = vadd.f32 %v275_v54, %v274_v52 }
 0x234   :  { %v277_v57 = vmul.f32 0.0625, %v276_v56  ;;  %v278_v58 = vmul.f32 %v265_v55, %v265_v55 }
 0x236   :  { %v279_v59 = vsub.f32 %v277_v57, %v278_v58 }
 0x238   :  { %v280_v60 = vmax.f32 %v279_v59, 0.0 }
 0x23a   :  { %v281_v61 = vadd.f32 1e-05, %v280_v60 }
 0x23c   :  { %2150 = vrsqrt.f32 %v281_v61 }
 0x249   :  { %v2151_v62 = vpop.eup %2150 }
 0x24a   :  { %v283_v63 = vmul.f32 %v2151_v62, %v55_v15 }
 0x24c   :  { %v284_v1 = vmul.f32 %v283_v63, %v265_v55  ;;  %v292_v4 = vrot.slane %v283_v63, %v2334_v0 }
 0x24e   :  { %v286_v5 = vrot.slane %v284_v1, 7  ;;  %v294_v8 = vmul.f32 %v292_v4, %v254_v33  ;;  %v293_v10 = vmul.f32 %v292_v4, %v253_v36 }
 0x250   :  { %v288_v7 = vsub.f32 %v55_v15, %v286_v5  ;;  %v1853_v15 = vld [vmem:[%s2639_s3 + $0x20] sm:$0xff]  ;;  %v1871_v5 = vld [vmem:[%s2639_s3 + $0x58] sm:$0xff] }
 0x251   :  { %2025 = vmatprep.subr.mxu1 %v1853_v15 }
 0x252   :  { %v298_v9 = vrot.slane %v288_v7, %v2338_v6  ;;  %2026 = vmatpush3.msra.mxu1 %v1853_v15  ;;  %v1870_v7 = vld [vmem:[%s2639_s3 + $0x50] sm:$0xff] }
 0x253   :  { %2030 = vmatprep.subr.mxu1 %v1862_v18 }
 0x254   :  { %v2341_v11 = vadd.f32 %v298_v9, %v294_v8  ;;  %v2344_v14 = vadd.f32 %v298_v9, %v293_v10 }
 0x256   :  { %2012 = vmatprep.subr.mxu0 %v2341_v11 }
 0x257   :  { %2013 = vmatpush3.msra.mxu0 %v2341_v11 }
 0x258   :  { %2014 = vmatprep.subr.mxu0 %v2344_v14 }
 0x259   :  { %2015 = vmatpush3.msra.mxu0 %v2344_v14 }
 0x25a   :  { %2017 = vmatmul.mubr.msk.f32.vlgmr.msra.gmra.mxu0 %vm56_vm0, %v2286_v3 }
 0x25b   :  { %2045 = vmatprep.mubr.msk.f32.mxu0 %vm56_vm0, %v2282_v2 }
 0x31a   :  { %v2018_v16 = vpop.f32.mrf.mxu0 }
 0x31c   :  { %v369_v17 = vpop.f32.mrf.mxu0 }
 0x31d   :  { %2027 = vmatprep.mubr.msk.f32.mxu1 %vm171_vm1, %v369_v17 }
 0x31e   :  { %2028 = vmatmul.mubr.msk.f32.vlgmr.msra.gmra.mxu1 %vm171_vm1, %v2018_v16 }
 0x31f   :  { %2031 = vmatpush3.msra.mxu1 %v1862_v18 }
 0x320   :  { %2032 = vmatprep.subr.mxu1 %v1861_v19 }
 0x321   :  { %2033 = vmatpush3.msra.mxu1 %v1861_v19 }
 0x322   :  { %2034 = vmatprep.subr.mxu1 %v1860_v20 }
 0x323   :  { %2035 = vmatpush3.msra.mxu1 %v1860_v20  ;;  %v1869_v20 = vld [vmem:[%s2639_s3 + $0x48] sm:$0xff] }
 0x324   :  { %2036 = vmatprep.subr.mxu1 %v1859_v21 }
 0x325   :  { %2037 = vmatpush3.msra.mxu1 %v1859_v21  ;;  %v1868_v21 = vld [vmem:[%s2639_s3 + $0x40] sm:$0xff] }
 0x326   :  { %2048 = vmatprep.subr.mxu1 %v1871_v5 }
 0x3de   :  { %v2029_v24 = vpop.f32.mrf.mxu1 }
 0x3df   :  { %v465_v25 = vadd.f32 %v2029_v24, %v386_v23  ;;  %v1877_v24 = vld [vmem:[%s2640_s4 + $0x58] sm:$0xff] }
 0x3e0   :  { %v459_v26 = vpop.f32.mrf.mxu1 }
 0x3e1   :  { %v460_v27 = vadd.f32 %v459_v26, %v386_v23  ;;  %v474_v30 = vmax.f32 %v465_v25, 0.0  ;;  %v1876_v25 = vld [vmem:[%s2640_s4 + $0x50] sm:$0xff]  ;;  %v1875_v26 = vld [vmem:[%s2640_s4 + $0x48] sm:$0xff] }
 0x3e3   :  { %v473_v29 = vmax.f32 %v460_v27, 0.0  ;;  %v1874_v27 = vld [vmem:[%s2640_s4 + $0x40] sm:$0xff] }
 0x3e5   :  { %2038 = vmatprep.mubr.msk.f32.mxu1 %vm171_vm1, %v473_v29  ;;  %v1865_v29 = vld [vmem:[%s2641_s5 + $0x8] sm:$0xf] }
 0x3e6   :  { %2039 = vmatmul.mubr.msk.f32.vlgmr.msra.gmra.mxu1 %vm171_vm1, %v474_v30  ;;  %v692_v30 = vrot.slane %v1865_v29, %v2307_v13 }
 0x3e7   :  { %2049 = vmatpush3.msra.mxu1 %v1871_v5 }
 0x3e8   :  { %2050 = vmatprep.subr.mxu1 %v1870_v7 }
 0x3e9   :  { %2051 = vmatpush3.msra.mxu1 %v1870_v7 }
 0x3ea   :  { %2052 = vmatprep.subr.mxu1 %v1869_v20 }
 0x3eb   :  { %2053 = vmatpush3.msra.mxu1 %v1869_v20 }
 0x3ec   :  { %2054 = vmatprep.subr.mxu1 %v1868_v21 }
 0x3ed   :  { %2055 = vmatpush3.msra.mxu1 %v1868_v21 }
 0x3ee   :  { %2059 = vmatprep.subr.mxu1 %v1877_v24 }
 0x4a6   :  { %v2040_v32 = vpop.f32.mrf.mxu1 }
 0x4a7   :  { %v557_v33 = vadd.f32 %v2040_v32, %v478_v31 }
 0x4a8   :  { %v551_v34 = vpop.f32.mrf.mxu1 }
 0x4a9   :  { %v561_v35 = vmax.f32 %v557_v33, 0.0  ;;  %v552_v36 = vadd.f32 %v551_v34, %v478_v31 }
 0x4ab   :  { %v573_v37 = vmul.f32 %v561_v35, %v561_v35  ;;  %v560_v38 = vmax.f32 %v552_v36, 0.0  ;;  %v563_v39 = vsel %vm171_vm1, %v561_v35, 0.0 }
 0x4ad   :  { %v562_v40 = vsel %vm171_vm1, %v560_v38, 0.0  ;;  %v572_v41 = vmul.f32 %v560_v38, %v560_v38  ;;  %v575_v43 = vsel %vm171_vm1, %v573_v37, 0.0  ;;  %v784_v37 = vrot.slane %v1865_v29, %v2326_v28 }
 0x4ae   :  { %v564_v42 = vadd.f32 %v563_v39, %v562_v40 }
 0x4af   :  { %v574_v44 = vsel %vm171_vm1, %v572_v41, 0.0 }
 0x4b0   :  { %v565_v45 = vrot.slane %v564_v42, 4  ;;  %v576_v46 = vadd.f32 %v575_v43, %v574_v44 }
 0x4b2   :  { %v566_v47 = vadd.f32 %v565_v45, %v564_v42  ;;  %v577_v48 = vrot.slane %v576_v46, 4 }
 0x4b4   :  { %v567_v49 = vrot.slane %v566_v47, 2  ;;  %v578_v50 = vadd.f32 %v577_v48, %v576_v46 }
 0x4b6   :  { %v568_v51 = vadd.f32 %v567_v49, %v566_v47  ;;  %v579_v52 = vrot.slane %v578_v50, 2 }
 0x4b8   :  { %v569_v53 = vrot.slane %v568_v51, 1  ;;  %v580_v54 = vadd.f32 %v579_v52, %v578_v50 }
 0x4ba   :  { %v570_v55 = vadd.f32 %v569_v53, %v568_v51  ;;  %v581_v56 = vrot.slane %v580_v54, 1 }
 0x4bc   :  { %v571_v57 = vmul.f32 0.0625, %v570_v55  ;;  %v582_v58 = vadd.f32 %v581_v56, %v580_v54 }
 0x4be   :  { %v583_v59 = vmul.f32 0.0625, %v582_v58  ;;  %v584_v60 = vmul.f32 %v571_v57, %v571_v57 }
 0x4c0   :  { %v585_v61 = vsub.f32 %v583_v59, %v584_v60 }
 0x4c2   :  { %v586_v62 = vmax.f32 %v585_v61, 0.0 }
 0x4c4   :  { %v587_v63 = vadd.f32 1e-05, %v586_v62 }
 0x4c6   :  { %2152 = vrsqrt.f32 %v587_v63 }
 0x4d3   :  { %v2153_v1 = vpop.eup %2152 }
 0x4d4   :  { %v589_v4 = vmul.f32 %v2153_v1, %v1850_v22 }
 0x4d6   :  { %v590_v8 = vmul.f32 %v589_v4, %v571_v57  ;;  %v598_v9 = vrot.slane %v589_v4, %v2334_v0 }
 0x4d8   :  { %v592_v10 = vrot.slane %v590_v8, 7  ;;  %v599_v15 = vmul.f32 %v598_v9, %v560_v38  ;;  %v600_v16 = vmul.f32 %v598_v9, %v561_v35 }
 0x4da   :  { %v594_v12 = vsub.f32 %v1850_v22, %v592_v10 }
 0x4dc   :  { %v604_v17 = vrot.slane %v594_v12, %v2338_v6 }
 0x4de   :  { %v606_v18 = vadd.f32 %v604_v17, %v600_v16  ;;  %v605_v19 = vadd.f32 %v604_v17, %v599_v15  ;;  %v1886_v15 = vld [vmem:[%s2639_s3 + $0x78] sm:$0xff]  ;;  %v1885_v16 = vld [vmem:[%s2639_s3 + $0x70] sm:$0xff] }
 0x4e0   :  { %1529 = vrot.lane.b32.xlu1 %v606_v18, %s2212_s14  ;;  %2041 = vmatprep.subr.mxu0 %v606_v18 }
 0x4e1   :  { %1527 = vrot.lane.b32.xlu0 %v605_v19, %s2212_s14  ;;  %2042 = vmatpush3.msra.mxu0 %v606_v18 }
 0x4e2   :  { %2043 = vmatprep.subr.mxu0 %v605_v19 }
 0x4e3   :  { %2044 = vmatpush3.msra.mxu0 %v605_v19 }
 0x4e4   :  { %2046 = vmatmul.mubr.msk.f32.vlgmr.msra.gmra.mxu0 %vm56_vm0, %v2286_v3  ;;  %2077 = vmatprep.subr.mxu0 %v1886_v15 }
 0x4e5   :  { %2078 = vmatpush3.msra.mxu0 %v1886_v15 }
 0x4e6   :  { %2079 = vmatprep.subr.mxu0 %v1885_v16 }
 0x4e7   :  { %2080 = vmatpush3.msra.mxu0 %v1885_v16 }
 0x5a4   :  { %v2047_v22 = vpop.f32.mrf.mxu0 }
 0x5a6   :  { %v675_v23 = vpop.f32.mrf.mxu0 }
 0x5a7   :  { %2056 = vmatprep.mubr.msk.f32.mxu1 %vm171_vm1, %v675_v23 }
 0x5a8   :  { %2057 = vmatmul.mubr.msk.f32.vlgmr.msra.gmra.mxu1 %vm171_vm1, %v2047_v22 }
 0x5a9   :  { %2060 = vmatpush3.msra.mxu1 %v1877_v24 }
 0x5aa   :  { %2061 = vmatprep.subr.mxu1 %v1876_v25 }
 0x5ab   :  { %2062 = vmatpush3.msra.mxu1 %v1876_v25 }
 0x5ac   :  { %2063 = vmatprep.subr.mxu1 %v1875_v26 }
 0x5ad   :  { %2064 = vmatpush3.msra.mxu1 %v1875_v26  ;;  %v1884_v26 = vld [vmem:[%s2639_s3 + $0x68] sm:$0xff] }
 0x5ae   :  { %2065 = vmatprep.subr.mxu1 %v1874_v27  ;;  %2081 = vmatprep.subr.mxu0 %v1884_v26 }
 0x5af   :  { %2066 = vmatpush3.msra.mxu1 %v1874_v27  ;;  %2082 = vmatpush3.msra.mxu0 %v1884_v26  ;;  %v1883_v27 = vld [vmem:[%s2639_s3 + $0x60] sm:$0xff] }
 0x5b0   :  { %2083 = vmatprep.subr.mxu0 %v1883_v27 }
 0x5b1   :  { %2084 = vmatpush3.msra.mxu0 %v1883_v27 }
 0x668   :  { %v2058_v31 = vpop.f32.mrf.mxu1 }
 0x669   :  { %v771_v32 = vadd.f32 %v2058_v31, %v692_v30  ;;  %v1892_v31 = vld [vmem:[%s2640_s4 + $0x78] sm:$0xff] }
 0x66a   :  { %v765_v33 = vpop.f32.mrf.mxu1 }
 0x66b   :  { %v766_v34 = vadd.f32 %v765_v33, %v692_v30  ;;  %v780_v36 = vmax.f32 %v771_v32, 0.0  ;;  %v1891_v32 = vld [vmem:[%s2640_s4 + $0x70] sm:$0xff]  ;;  %v1890_v33 = vld [vmem:[%s2640_s4 + $0x68] sm:$0xff] }
 0x66d   :  { %v779_v35 = vmax.f32 %v766_v34, 0.0  ;;  %v1880_v34 = vld [vmem:[%s2641_s5 + $0xc] sm:$0xf] }
 0x66f   :  { %2067 = vmatprep.mubr.msk.f32.mxu1 %vm171_vm1, %v779_v35  ;;  %v998_v35 = vrot.slane %v1880_v34, %v2307_v13 }
 0x670   :  { %2068 = vmatmul.mubr.msk.f32.vlgmr.msra.gmra.mxu1 %vm171_vm1, %v780_v36 }
 0x671   :  { %2074 = vmatprep.mubr.msk.f32.mxu1 %vm56_vm0, %v2282_v2 }
 0x730   :  { %v2069_v38 = vpop.f32.mrf.mxu1 }
 0x731   :  { %v863_v39 = vadd.f32 %v2069_v38, %v784_v37 }
 0x732   :  { %v857_v40 = vpop.f32.mrf.mxu1 }
 0x733   :  { %v867_v41 = vmax.f32 %v863_v39, 0.0  ;;  %v858_v42 = vadd.f32 %v857_v40, %v784_v37 }
 0x735   :  { %v879_v43 = vmul.f32 %v867_v41, %v867_v41  ;;  %v866_v44 = vmax.f32 %v858_v42, 0.0  ;;  %v869_v45 = vsel %vm171_vm1, %v867_v41, 0.0  ;;  %v1090_v42 = vrot.slane %v1880_v34, %v2326_v28 }
 0x737   :  { %v868_v46 = vsel %vm171_vm1, %v866_v44, 0.0  ;;  %v878_v47 = vmul.f32 %v866_v44, %v866_v44  ;;  %v881_v49 = vsel %vm171_vm1, %v879_v43, 0.0 }
 0x738   :  { %v870_v48 = vadd.f32 %v869_v45, %v868_v46 }
 0x739   :  { %v880_v50 = vsel %vm171_vm1, %v878_v47, 0.0 }
 0x73a   :  { %v871_v51 = vrot.slane %v870_v48, 4  ;;  %v882_v52 = vadd.f32 %v881_v49, %v880_v50 }
 0x73c   :  { %v872_v53 = vadd.f32 %v871_v51, %v870_v48  ;;  %v883_v54 = vrot.slane %v882_v52, 4 }
 0x73e   :  { %v873_v55 = vrot.slane %v872_v53, 2  ;;  %v884_v56 = vadd.f32 %v883_v54, %v882_v52 }
 0x740   :  { %v874_v57 = vadd.f32 %v873_v55, %v872_v53  ;;  %v885_v58 = vrot.slane %v884_v56, 2 }
 0x742   :  { %v875_v59 = vrot.slane %v874_v57, 1  ;;  %v886_v60 = vadd.f32 %v885_v58, %v884_v56 }
 0x744   :  { %v876_v61 = vadd.f32 %v875_v59, %v874_v57  ;;  %v887_v62 = vrot.slane %v886_v60, 1 }
 0x746   :  { %v877_v63 = vmul.f32 0.0625, %v876_v61  ;;  %v888_v1 = vadd.f32 %v887_v62, %v886_v60 }
 0x748   :  { %v889_v4 = vmul.f32 0.0625, %v888_v1  ;;  %v890_v5 = vmul.f32 %v877_v63, %v877_v63 }
 0x74a   :  { %v891_v7 = vsub.f32 %v889_v4, %v890_v5 }
 0x74c   :  { %v892_v8 = vmax.f32 %v891_v7, 0.0 }
 0x74e   :  { %v893_v9 = vadd.f32 1e-05, %v892_v8 }
 0x750   :  { %2154 = vrsqrt.f32 %v893_v9 }
 0x75d   :  { %v2155_v10 = vpop.eup %2154 }
 0x75e   :  { %v895_v12 = vmul.f32 %v2155_v10, %v1865_v29 }
 0x760   :  { %v896_v17 = vmul.f32 %v895_v12, %v877_v63  ;;  %v904_v18 = vrot.slane %v895_v12, %v2334_v0 }
 0x762   :  { %v898_v19 = vrot.slane %v896_v17, 7  ;;  %v905_v21 = vmul.f32 %v904_v18, %v866_v44  ;;  %v906_v22 = vmul.f32 %v904_v18, %v867_v41 }
 0x764   :  { %v900_v20 = vsub.f32 %v1865_v29, %v898_v19 }
 0x766   :  { %v910_v23 = vrot.slane %v900_v20, %v2338_v6 }
 0x768   :  { %v912_v24 = vadd.f32 %v910_v23, %v906_v22  ;;  %v911_v25 = vadd.f32 %v910_v23, %v905_v21  ;;  %v1901_v21 = vld [vmem:[%s2639_s3 + $0x98] sm:$0xff]  ;;  %v1900_v22 = vld [vmem:[%s2639_s3 + $0x90] sm:$0xff] }
 0x76a   :  { %1537 = vrot.lane.b32.xlu1 %v912_v24, %s2213_s11  ;;  %2070 = vmatprep.subr.mxu1 %v912_v24 }
 0x76b   :  { %1535 = vrot.lane.b32.xlu0 %v911_v25, %s2213_s11  ;;  %2071 = vmatpush3.msra.mxu1 %v912_v24 }
 0x76c   :  { %2072 = vmatprep.subr.mxu1 %v911_v25 }
 0x76d   :  { %2073 = vmatpush3.msra.mxu1 %v911_v25 }
 0x76e   :  { %2075 = vmatmul.mubr.msk.f32.vlgmr.msra.gmra.mxu1 %vm56_vm0, %v2286_v3  ;;  %2088 = vmatprep.subr.mxu1 %v1892_v31 }
 0x76f   :  { %2089 = vmatpush3.msra.mxu1 %v1892_v31 }
 0x770   :  { %2090 = vmatprep.subr.mxu1 %v1891_v32 }
 0x771   :  { %2091 = vmatpush3.msra.mxu1 %v1891_v32  ;;  %v1899_v32 = vld [vmem:[%s2639_s3 + $0x88] sm:$0xff] }
 0x772   :  { %2092 = vmatprep.subr.mxu1 %v1890_v33 }
 0x773   :  { %2093 = vmatpush3.msra.mxu1 %v1890_v33  ;;  %v1898_v33 = vld [vmem:[%s2639_s3 + $0x80] sm:$0xff] }
 0x82e   :  { %v2076_v29 = vpop.f32.mrf.mxu1 }
 0x830   :  { %v981_v30 = vpop.f32.mrf.mxu1 }
 0x831   :  { %2085 = vmatprep.mubr.msk.f32.mxu0 %vm171_vm1, %v981_v30 }
 0x832   :  { %2086 = vmatmul.mubr.msk.f32.vlgmr.msra.gmra.mxu0 %vm171_vm1, %v2076_v29 }
 0x833   :  { %2103 = vmatprep.mubr.msk.f32.mxu0 %vm56_vm0, %v2282_v2  ;;  %v1889_v2 = vld [vmem:[%s2640_s4 + $0x60] sm:$0xff] }
 0x834   :  { %2094 = vmatprep.subr.mxu1 %v1889_v2 }
 0x835   :  { %2095 = vmatpush3.msra.mxu1 %v1889_v2 }
 0x836   :  { %2106 = vmatprep.subr.mxu1 %v1901_v21 }
 0x8f2   :  { %v2087_v36 = vpop.f32.mrf.mxu0 }
 0x8f3   :  { %v1077_v37 = vadd.f32 %v2087_v36, %v998_v35  ;;  %v1905_v36 = vld [vmem:[%s2640_s4 + $0x88] sm:$0xff] }
 0x8f4   :  { %v1071_v38 = vpop.f32.mrf.mxu0 }
 0x8f5   :  { %v1072_v39 = vadd.f32 %v1071_v38, %v998_v35  ;;  %v1086_v41 = vmax.f32 %v1077_v37, 0.0  ;;  %v1906_v35 = vld [vmem:[%s2640_s4 + $0x90] sm:$0xff]  ;;  %v1904_v37 = vld [vmem:[%s2640_s4 + $0x80] sm:$0xff] }
 0x8f6   :  { %v2503_v38 = vld [vmem:[%s2641_s5 + $0x10] sm:$0xf] }
 0x8f7   :  { %v1085_v40 = vmax.f32 %v1072_v39, 0.0  ;;  %v1304_v39 = vrot.slane %v2503_v38, %v2307_v13  ;;  %v1645_v13 = vld [vmem:[%s2642_s6 + $0x70] sm:$0xff] }
 0x8f9   :  { %2096 = vmatprep.mubr.msk.f32.mxu1 %vm171_vm1, %v1085_v40 }
 0x8fa   :  { %2097 = vmatmul.mubr.msk.f32.vlgmr.msra.gmra.mxu1 %vm171_vm1, %v1086_v41 }
 0x8fb   :  { %2107 = vmatpush3.msra.mxu1 %v1901_v21 }
 0x8fc   :  { %2108 = vmatprep.subr.mxu1 %v1900_v22 }
 0x8fd   :  { %2109 = vmatpush3.msra.mxu1 %v1900_v22 }
 0x8fe   :  { %2110 = vmatprep.subr.mxu1 %v1899_v32 }
 0x8ff   :  { %2111 = vmatpush3.msra.mxu1 %v1899_v32 }
 0x900   :  { %2112 = vmatprep.subr.mxu1 %v1898_v33 }
 0x901   :  { %2113 = vmatpush3.msra.mxu1 %v1898_v33 }
 0x9ba   :  { %v2098_v43 = vpop.f32.mrf.mxu1 }
 0x9bb   :  { %v1169_v44 = vadd.f32 %v2098_v43, %v1090_v42 }
 0x9bc   :  { %v1163_v45 = vpop.f32.mrf.mxu1 }
 0x9bd   :  { %v1173_v46 = vmax.f32 %v1169_v44, 0.0  ;;  %v1164_v47 = vadd.f32 %v1163_v45, %v1090_v42 }
 0x9bf   :  { %v1185_v48 = vmul.f32 %v1173_v46, %v1173_v46  ;;  %v1172_v49 = vmax.f32 %v1164_v47, 0.0  ;;  %v1175_v50 = vsel %vm171_vm1, %v1173_v46, 0.0  ;;  %v1646_v47 = vld [vmem:[%s2642_s6 + $0x78] sm:$0xff] }
 0x9c1   :  { %v1174_v51 = vsel %vm171_vm1, %v1172_v49, 0.0  ;;  %v1184_v52 = vmul.f32 %v1172_v49, %v1172_v49  ;;  %v1187_v54 = vsel %vm171_vm1, %v1185_v48, 0.0  ;;  %v1644_v48 = vld [vmem:[%s2642_s6 + $0x68] sm:$0xff] }
 0x9c2   :  { %v1176_v53 = vadd.f32 %v1175_v50, %v1174_v51  ;;  %v1642_v50 = vld [vmem:[%s2642_s6 + $0x58] sm:$0xff]  ;;  %v1641_v51 = vld [vmem:[%s2642_s6 + $0x50] sm:$0xff] }
 0x9c3   :  { %v1186_v55 = vsel %vm171_vm1, %v1184_v52, 0.0  ;;  %v1640_v52 = vld [vmem:[%s2642_s6 + $0x48] sm:$0xff] }
 0x9c4   :  { %v1177_v56 = vrot.slane %v1176_v53, 4  ;;  %v1188_v57 = vadd.f32 %v1187_v54, %v1186_v55  ;;  %v1638_v54 = vld [vmem:[%s2642_s6 + $0x38] sm:$0xff]  ;;  %v1637_v55 = vld [vmem:[%s2642_s6 + $0x30] sm:$0xff] }
 0x9c6   :  { %v1178_v58 = vadd.f32 %v1177_v56, %v1176_v53  ;;  %v1189_v59 = vrot.slane %v1188_v57, 4  ;;  %v1639_v53 = vld [vmem:[%s2642_s6 + $0x40] sm:$0xff]  ;;  %v1636_v56 = vld [vmem:[%s2642_s6 + $0x28] sm:$0xff] }
 0x9c8   :  { %v1179_v60 = vrot.slane %v1178_v58, 2  ;;  %v1190_v61 = vadd.f32 %v1189_v59, %v1188_v57  ;;  %v1635_v57 = vld [vmem:[%s2642_s6 + $0x20] sm:$0xff]  ;;  %v1633_v59 = vld [vmem:[%s2642_s6 + $0x10] sm:$0xff] }
 0x9ca   :  { %v1180_v62 = vadd.f32 %v1179_v60, %v1178_v58  ;;  %v1191_v63 = vrot.slane %v1190_v61, 2  ;;  %v1634_v58 = vld [vmem:[%s2642_s6 + $0x18] sm:$0xff]  ;;  %v1632_v60 = vld [vmem:[%s2642_s6 + $0x8] sm:$0xff] }
 0x9cc   :  { %v1181_v1 = vrot.slane %v1180_v62, 1  ;;  %v1192_v4 = vadd.f32 %v1191_v63, %v1190_v61  ;;  %v1631_v61 = vld [vmem:[%s2642_s6] sm:$0xff]  ;;  %v1649_v63 = vld [vmem:[%s2642_s6 + $0x90] sm:$0xff] }
 0x9ce   :  { %v1182_v5 = vadd.f32 %v1181_v1, %v1180_v62  ;;  %v1193_v7 = vrot.slane %v1192_v4, 1  ;;  %v1650_v62 = vld [vmem:[%s2642_s6 + $0x98] sm:$0xff]  ;;  %v1396_v1 = vrot.slane %v2503_v38, %v2326_v28 }
 0x9d0   :  { %v1183_v8 = vmul.f32 0.0625, %v1182_v5  ;;  %v1194_v9 = vadd.f32 %v1193_v7, %v1192_v4 }
 0x9d2   :  { %v1195_v10 = vmul.f32 0.0625, %v1194_v9  ;;  %v1196_v12 = vmul.f32 %v1183_v8, %v1183_v8 }
 0x9d4   :  { %v1197_v15 = vsub.f32 %v1195_v10, %v1196_v12 }
 0x9d6   :  { %v1198_v16 = vmax.f32 %v1197_v15, 0.0 }
 0x9d8   :  { %v1199_v17 = vadd.f32 1e-05, %v1198_v16 }
 0x9da   :  { %2156 = vrsqrt.f32 %v1199_v17 }
 0x9e7   :  { %v2157_v18 = vpop.eup %2156 }
 0x9e8   :  { %v1201_v19 = vmul.f32 %v2157_v18, %v1880_v34 }
 0x9ea   :  { %v1202_v20 = vmul.f32 %v1201_v19, %v1183_v8  ;;  %v1210_v23 = vrot.slane %v1201_v19, %v2334_v0 }
 0x9ec   :  { %v1204_v24 = vrot.slane %v1202_v20, 7  ;;  %v1212_v26 = vmul.f32 %v1210_v23, %v1173_v46  ;;  %v1211_v29 = vmul.f32 %v1210_v23, %v1172_v49  ;;  %v2215_v46 = vmov 0.0   ;;  %v1643_v49 = vld [vmem:[%s2642_s6 + $0x60] sm:$0xff] }
 0x9ee   :  { %v1206_v25 = vsub.f32 %v1880_v34, %v1204_v24 }
 0x9f0   :  { %v1216_v27 = vrot.slane %v1206_v25, %v2338_v6 }
 0x9f2   :  { %v1218_v30 = vadd.f32 %v1216_v27, %v1212_v26  ;;  %v1217_v31 = vadd.f32 %v1216_v27, %v1211_v29 }
 0x9f4   :  { %1545 = vrot.lane.b32.xlu1 %v1218_v30, %s2214_s28  ;;  %2099 = vmatprep.subr.mxu0 %v1218_v30 }
 0x9f5   :  { %2100 = vmatpush3.msra.mxu0 %v1218_v30 }
 0x9f6   :  { %2101 = vmatprep.subr.mxu0 %v1217_v31 }
 0x9f7   :  { %2102 = vmatpush3.msra.mxu0 %v1217_v31 }
 0x9f8   :  { %1543 = vrot.lane.b32.xlu1 %v1217_v31, %s2214_s28  ;;  %2104 = vmatmul.mubr.msk.f32.vlgmr.msra.gmra.mxu0 %vm56_vm0, %v2286_v3  ;;  %v1907_v3 = vld [vmem:[%s2640_s4 + $0x98] sm:$0xff] }
 0x9f9   :  { %2117 = vmatprep.subr.mxu0 %v1907_v3 }
 0x9fa   :  { %2118 = vmatpush3.msra.mxu0 %v1907_v3 }
 0x9fb   :  { %2119 = vmatprep.subr.mxu0 %v1906_v35 }
 0x9fc   :  { %2120 = vmatpush3.msra.mxu0 %v1906_v35 }
 0x9fd   :  { %2121 = vmatprep.subr.mxu0 %v1905_v36 }
 0x9fe   :  { %2122 = vmatpush3.msra.mxu0 %v1905_v36 }
 0x9ff   :  { %2123 = vmatprep.subr.mxu0 %v1904_v37 }
 0xa00   :  { %2124 = vmatpush3.msra.mxu0 %v1904_v37 }
 0xa01   :  { %1661 = vmatprep.subr.mxu0 %v2215_v46 }
 0xab8   :  { %v2105_v2 = vpop.f32.mrf.mxu0 }
 0xaba   :  { %v1287_v34 = vpop.f32.mrf.mxu0 }
 0xabb   :  { %2114 = vmatprep.mubr.msk.f32.mxu1 %vm171_vm1, %v1287_v34 }
 0xabc   :  { %2115 = vmatmul.mubr.msk.f32.vlgmr.msra.gmra.mxu1 %vm171_vm1, %v2105_v2 }
 0xabd   :  { %1624 = vmatprep.mubr.f32.mxu1 %v2215_v46 }
 0xb7c   :  { %v2116_v40 = vpop.f32.mrf.mxu1 }
 0xb7d   :  { %v1383_v41 = vadd.f32 %v2116_v40, %v1304_v39 }
 0xb7e   :  { %v1377_v42 = vpop.f32.mrf.mxu1 }
 0xb7f   :  { %v1378_v43 = vadd.f32 %v1377_v42, %v1304_v39  ;;  %v1392_v45 = vmax.f32 %v1383_v41, 0.0  ;;  %v1530_v39 = vpop.permute.xlu1 %1529 }
 0xb81   :  { %v1391_v44 = vmax.f32 %v1378_v43, 0.0 }
 0xb83   :  { %2125 = vmatprep.mubr.msk.f32.mxu0 %vm171_vm1, %v1391_v44  ;;  %v1538_v42 = vpop.permute.xlu1 %1537 }
 0xb84   :  { %2126 = vmatmul.mubr.msk.f32.vlgmr.msra.gmra.mxu0 %vm171_vm1, %v1392_v45 }
 0xb85   :  { %1662 = vmatpush1.msra.mxu0 %v1646_v47 }
 0xb86   :  { %1663 = vmatprep.subr.mxu0 %v2215_v46 }
 0xb87   :  { %1664 = vmatpush1.msra.mxu0 %v1645_v13  ;;  %v1546_v47 = vpop.permute.xlu1 %1545  ;;  %v1528_v13 = vpop.permute.xlu0 %1527 }
 0xb88   :  { %1665 = vmatprep.subr.mxu0 %v2215_v46 }
 0xb89   :  { %1666 = vmatpush1.msra.mxu0 %v1644_v48 }
 0xb8a   :  { %1667 = vmatprep.subr.mxu0 %v2215_v46 }
 0xb8b   :  { %1668 = vmatpush1.msra.mxu0 %v1643_v49 }
 0xb8c   :  { %1669 = vmatprep.subr.mxu0 %v2215_v46 }
 0xb8d   :  { %1670 = vmatpush1.msra.mxu0 %v1642_v50 }
 0xb8e   :  { %1671 = vmatprep.subr.mxu0 %v2215_v46 }
 0xb8f   :  { %1672 = vmatpush1.msra.mxu0 %v1641_v51  ;;  %v1550_v51 = vsel %vm171_vm1, %v2341_v11, %v1530_v39  ;;  %v1648_v11 = vld [vmem:[%s2642_s6 + $0x88] sm:$0xff] }
 0xb90   :  { %1673 = vmatprep.subr.mxu0 %v2215_v46 }
 0xb91   :  { %1674 = vmatpush1.msra.mxu0 %v1640_v52  ;;  %v1536_v52 = vpop.permute.xlu0 %1535 }
 0xb92   :  { %1675 = vmatprep.subr.mxu0 %v2215_v46 }
 0xb93   :  { %1676 = vmatpush1.msra.mxu0 %v1639_v53 }
 0xb94   :  { %1677 = vmatprep.subr.mxu0 %v2215_v46 }
 0xb95   :  { %1678 = vmatpush1.msra.mxu0 %v1638_v54 }
 0xb96   :  { %1679 = vmatprep.subr.mxu0 %v2215_v46 }
 0xb97   :  { %1680 = vmatpush1.msra.mxu0 %v1637_v55  ;;  %v1553_v55 = vsel %vm1551_vm2, %v1550_v51, %v1538_v42 }
 0xb98   :  { %1681 = vmatprep.subr.mxu0 %v2215_v46 }
 0xb99   :  { %1682 = vmatpush1.msra.mxu0 %v1636_v56  ;;  %v1544_v56 = vpop.permute.xlu1 %1543 }
 0xb9a   :  { %1683 = vmatprep.subr.mxu0 %v2215_v46 }
 0xb9b   :  { %1684 = vmatpush1.msra.mxu0 %v1635_v57  ;;  %v1556_v57 = vsel %vm1554_vm3, %v1553_v55, %v1546_v47 }
 0xb9c   :  { %1685 = vmatprep.subr.mxu0 %v2215_v46 }
 0xb9d   :  { %1686 = vmatpush1.msra.mxu0 %v1634_v58 }
 0xb9e   :  { %1687 = vmatprep.subr.mxu0 %v2215_v46 }
 0xb9f   :  { %1688 = vmatpush1.msra.mxu0 %v1633_v59 }
 0xba0   :  { %1689 = vmatprep.subr.mxu0 %v2215_v46 }
 0xba1   :  { %1690 = vmatpush1.msra.mxu0 %v1632_v60  ;;  %v1735_v60 = vld [vmem:[%s2644_s8 + $0x18] sm:$0xff] }
 0xba2   :  { %1691 = vmatprep.subr.mxu0 %v2215_v46 }
 0xba3   :  { %1692 = vmatpush1.msra.mxu0 %v1631_v61 }
 0xba4   :  { %1717 = vmatprep.subr.mxu0 %v2215_v46 }
 0xba5   :  { %1718 = vmatpush2.msra.mxu0 %v1650_v62 }
 0xba6   :  { %1719 = vmatprep.subr.mxu0 %v2215_v46 }
 0xba7   :  { %1720 = vmatpush2.msra.mxu0 %v1649_v63  ;;  %v1734_v63 = vld [vmem:[%s2644_s8 + $0x10] sm:$0xff] }
 0xba8   :  { %1721 = vmatprep.subr.mxu0 %v2215_v46 }
 0xba9   :  { %1722 = vmatpush2.msra.mxu0 %v1648_v11 }
 0xbaa   :  { %1723 = vmatprep.subr.mxu0 %v2215_v46 }
 0xc44   :  { %v2127_v4 = vpop.f32.mrf.mxu0 }
 0xc45   :  { %v1475_v5 = vadd.f32 %v2127_v4, %v1396_v1  ;;  %v1732_v4 = vld [vmem:[%s2644_s8] sm:$0xff] }
 0xc46   :  { %v1469_v7 = vpop.f32.mrf.mxu0 }
 0xc47   :  { %v1479_v8 = vmax.f32 %v1475_v5, 0.0  ;;  %v1470_v9 = vadd.f32 %v1469_v7, %v1396_v1  ;;  %v1733_v1 = vld [vmem:[%s2644_s8 + $0x8] sm:$0xff]  ;;  %v1911_v5 = vld [vmem:[%s2643_s7] ss:$0 sm:$0xff]  ;;  %s2217_s7 = smov [#allocation5]  }
 0xc48   :  { %s1837_s8 = sshll.u32 %s2217_s7, 4  ;;  %s1838_s8 = int_to_ptr.vmem [resolvable:$true] %s1837_s8 }
 0xc49   :  { %v1491_v10 = vmul.f32 %v1479_v8, %v1479_v8  ;;  %v1478_v12 = vmax.f32 %v1470_v9, 0.0  ;;  %v1481_v15 = vsel %vm171_vm1, %v1479_v8, 0.0  ;;  %p2189_p6 = scmp.lt.s32.totalorder %s1838_s8, %s1838_s8 }
 0xc4b   :  { %v1480_v16 = vsel %vm171_vm1, %v1478_v12, 0.0  ;;  %v1490_v17 = vmul.f32 %v1478_v12, %v1478_v12  ;;  %v1493_v19 = vsel %vm171_vm1, %v1491_v10, 0.0 }
 0xc4c   :  { %v1482_v18 = vadd.f32 %v1481_v15, %v1480_v16 }
 0xc4d   :  { %v1492_v20 = vsel %vm171_vm1, %v1490_v17, 0.0 }
 0xc4e   :  { %v1483_v21 = vrot.slane %v1482_v18, 4  ;;  %v1494_v22 = vadd.f32 %v1493_v19, %v1492_v20 }
 0xc50   :  { %v1484_v28 = vadd.f32 %v1483_v21, %v1482_v18  ;;  %v1495_v23 = vrot.slane %v1494_v22, 4 }
 0xc52   :  { %v1485_v24 = vrot.slane %v1484_v28, 2  ;;  %v1496_v25 = vadd.f32 %v1495_v23, %v1494_v22 }
 0xc54   :  { %v1486_v26 = vadd.f32 %v1485_v24, %v1484_v28  ;;  %v1497_v27 = vrot.slane %v1496_v25, 2 }
 0xc56   :  { %v1487_v29 = vrot.slane %v1486_v26, 1  ;;  %v1498_v30 = vadd.f32 %v1497_v27, %v1496_v25 }
 0xc58   :  { %v1488_v31 = vadd.f32 %v1487_v29, %v1486_v26  ;;  %v1499_v32 = vrot.slane %v1498_v30, 1 }
 0xc5a   :  { %v1489_v33 = vmul.f32 0.0625, %v1488_v31  ;;  %v1500_v2 = vadd.f32 %v1499_v32, %v1498_v30 }
 0xc5c   :  { %v1501_v34 = vmul.f32 0.0625, %v1500_v2  ;;  %v1502_v3 = vmul.f32 %v1489_v33, %v1489_v33 }
 0xc5e   :  { %v1503_v35 = vsub.f32 %v1501_v34, %v1502_v3 }
 0xc60   :  { %v1504_v36 = vmax.f32 %v1503_v35, 0.0 }
 0xc62   :  { %v1505_v37 = vadd.f32 1e-05, %v1504_v36 }
 0xc64   :  { %2158 = vrsqrt.f32 %v1505_v37 }
 0xc71   :  { %v2159_v40 = vpop.eup %2158 }
 0xc72   :  { %v1507_v41 = vmul.f32 %v2159_v40, %v2503_v38 }
 0xc74   :  { %v1508_v43 = vmul.f32 %v1507_v41, %v1489_v33  ;;  %v1516_v44 = vrot.slane %v1507_v41, %v2334_v0  ;;  %v1549_v0 = vsel %vm171_vm1, %v2344_v14, %v1528_v13  ;;  %v1647_v14 = vld [vmem:[%s2642_s6 + $0x80] sm:$0xff] }
 0xc75   :  { %1724 = vmatpush2.msra.mxu0 %v1647_v14 }
 0xc76   :  { %v1510_v45 = vrot.slane %v1508_v43, 7  ;;  %v1518_v49 = vmul.f32 %v1516_v44, %v1479_v8  ;;  %v1517_v53 = vmul.f32 %v1516_v44, %v1478_v12  ;;  %v1913_v12 = vld [vmem:[%s2645_s9] ss:$0 sm:$0xff]  ;;  %s2184_s9 = scalar_lea.vmem %s1838_s8, 32 }
 0xc77   :  { %p2185_p5 = scmp.ne.s32.totalorder %s1838_s8, %s2184_s9  ;;  %p2190_p7 = scmp.lt.s32.totalorder %s2184_s9, %s2184_s9 }
 0xc78   :  { %v1512_v48 = vsub.f32 %v2503_v38, %v1510_v45  ;;  %v1552_v38 = vsel %vm1551_vm2, %v1549_v0, %v1536_v52 }
 0xc79   :  { %v1555_v59 = vsel %vm1554_vm3, %v1552_v38, %v1544_v56  ;;  %p2191_p8 = por %p2190_p7, %p2189_p6 }
 0xc7a   :  { %v1522_v50 = vrot.slane %v1512_v48, %v2338_v6  ;;  %v52_v6 = vld [vmem:[%s2637_s1] sm:$0x3] }
 0xc7b   :  { %p2192_p9 = pnand %p2191_p8, %p2185_p5 }
 0xc7c   :  { %v1524_v54 = vadd.f32 %v1522_v50, %v1518_v49  ;;  %v1523_v58 = vadd.f32 %v1522_v50, %v1517_v53 }
 0xc7e   :  { %1588 = vmatprep.subr.mxu1 %v1524_v54 }
 0xc7f   :  { %1589 = vmatpush1.msra.mxu1 %v1556_v57 }
 0xc80   :  { %1590 = vmatprep.subr.mxu1 %v1523_v58 }
 0xc81   :  { %1591 = vmatpush1.msra.mxu1 %v1555_v59 }
 0xc82   :  { %1910 = vmatmul.mubr.msk.f32.vlgmr.msra.gmra.mxu1 %vm56_vm0, %v52_v6  ;;  %2128 = vmatprep.subr.mxu1 %v2215_v46 }
 0xc83   :  { %2129 = vmatpush3.msra.mxu1 %v1735_v60  ;;  %2136 = vmatprep.mubr.msk.f32.mxu1 %vm2216_vm4, %v2215_v46 }
 0xc84   :  { %2130 = vmatprep.subr.mxu1 %v2215_v46 }
 0xc85   :  { %2131 = vmatpush3.msra.mxu1 %v1734_v63 }
 0xc86   :  { %2132 = vmatprep.subr.mxu1 %v2215_v46 }
 0xc87   :  { %2133 = vmatpush3.msra.mxu1 %v1733_v1 }
 0xc88   :  { %2134 = vmatprep.subr.mxu1 %v2215_v46 }
 0xc89   :  { %2135 = vmatpush3.msra.mxu1 %v1732_v4 }
 0xd42   :  { %v1626_v61 = vpop.f32.mrf.mxu1 }
 0xd44   :  { %v1628_v62 = vpop.f32.mrf.mxu1 }
 0xd45   :  { %1912 = vmatprep.mubr.msk.f32.mxu0 %vm171_vm1, %v1628_v62 }
 0xd46   :  { %1726 = vmatmul.mubr.f32.vlgmr.msra.gmra.mxu0 %v1626_v61 }
 0xe06   :  { %v1727_v7 = vpop.f32.mrf.mxu0 }
 0xe07   :  { %v1728_v8 = vadd.f32 %v1911_v5, %v1727_v7 }
 0xe08   :  { %v1729_v9 = vpop.f32.mrf.mxu0 }
 0xe09   :  { %v1731_v10 = vmax.f32 %v1728_v8, 0.0 }
 0xe0b   :  { %2137 = vmatmul.mubr.msk.f32.vlgmr.msra.gmra.mxu1 %vm171_vm1, %v1731_v10 }
 0xecb   :  { %v1812_v15 = vpop.f32.mrf.mxu1 }
 0xecc   :  { %v1813_v16 = vadd.f32 %v1913_v12, %v1812_v15 }
 0xecd   :  { %v2138_v17 = vpop.f32.mrf.mxu1 }
 0xece   :  { %v1817_v46 = vsel %vm1816_vm5, %v1813_v16, -inf }
 0xecf   :  { %1818 = vmax.xlane.f32.xlu0 %v1817_v46 }
 0xf58   :  { %v1819_v18 = vpop.xlane.xlu0 %1818 }
 0xf59   :  { %v1820_v19 = vsub.f32 %v1813_v16, %v1819_v18 }
 0xf5b   :  { %v1821_v20 = vmul.f32 1.442695, %v1820_v19 }
 0xf5d   :  { %2160 = vpow2.f32 %v1821_v20 }
 0xf6a   :  { %v2161_v21 = vpop.eup %2160 }
 0xf6b   :  { %v1823_v22 = vsel %vm1816_vm5, %v2161_v21, 0.0 }
 0xf6c   :  { %1824 = vadd.xlane.f32.xlu1 %v1823_v22 }
 0xff5   :  { %v1825_v28 = vpop.xlane.xlu1 %1824 }
 0xff6   :  { %2162 = vlog2.f32 %v1825_v28 }
0x1003   :  { %v2163_v23 = vpop.eup %2162 }
0x1004   :  { %v1827_v24 = vmul.f32 0.6931472, %v2163_v23 }
0x1006   :  { %v1828_v25 = vadd.f32 %v1827_v24, %v1819_v18 }
0x1008   :  { %v1829_v26 = vsub.f32 %v1813_v16, %v1828_v25 }
0x100a   :  { %1830 = vst [vmem:[#allocation5] sm:$0x3] %v1829_v26 }
0x100b   :  { %2195 = shalt.err (!%p2192_p9)
}
0x100c   :  { %1840 = dma.vmem_to_hbm [thread:$0]  %s1838_s8, 32, %s2646_s10, [#allocation4]  }
0x100d   :  { %2206 = dma.done.wait [#allocation4], 32  }
0x100e   :  { %2207 = vsyncadd [#allocation4], 4294967264 }
0x100f   :  { %1844 = vsyncpa [#allocation3], 1 }
0x1010   :  { %1845 = vsyncpa [#allocation4], 1 }

</bundles_post_ra>
